<compile_context>
chip_gen: v7x
topology: tpu7x:2x2x1
jax: 0.10.0
libtpu: 0.0.40
codegen_flags: <defaults>
</compile_context>

<pallas_src>
import functools
import math

import jax
import jax.numpy as jnp
from jax.experimental import pallas as pl
from jax.experimental.pallas import tpu as pltpu


EDGE_TILE = 8     # edges per vectorized inner step (sublane height)
LANE = 128        # TPU lane width


def _round_up(x, m):
    return ((x + m - 1) // m) * m


# ---------------------------------------------------------------------------
# Fused kernel: grid = (num_layers,); node embeddings persist in VMEM scratch.
# ---------------------------------------------------------------------------
def gt_kernel(rows_ref, cols_ref,                           # scalar prefetch (SMEM int32)
              x_ref, wp_ref, wpb_ref, hb_ref,                # shared inputs
              wq_ref, wk_ref, wv_ref, gamma_ref, beta_ref,   # per-layer (streamed) weights
              invw_ref, invb_ref,
              o_ref,                                         # output (N, OUT_PAD)
              emb_ref, qn_ref, kn_ref, vn_ref,               # node-level scratch (N, D)
              norm_ref, res_ref,
              gq_ref, gk_ref, gv_ref, gn_ref,                # edge-tile staging (EDGE_TILE, D)
              *, n_edges, edge_tile, att_norm):
    f32 = jnp.float32
    layer = pl.program_id(0)

    # ---- first layer only: input projection (+ positional encoding folded into the bias)
    @pl.when(layer == 0)
    def _():
        emb_ref[...] = (jnp.dot(x_ref[...], wp_ref[...],
                                preferred_element_type=f32) + wpb_ref[...])

    emb = emb_ref[...]                                        # (N, D) residual input

    # ---- node-level q/k/v projections: three separate matmuls (no lane-split slices)
    qn_ref[...] = jnp.dot(emb, wq_ref[0], preferred_element_type=f32)
    kn_ref[...] = jnp.dot(emb, wk_ref[0], preferred_element_type=f32)
    vn_ref[...] = jnp.dot(emb, wv_ref[0], preferred_element_type=f32)
    norm_ref[...] = jnp.zeros_like(norm_ref)
    res_ref[...] = jnp.zeros_like(res_ref)

    hb = hb_ref[...]                                          # (D, D) block-diag head mask
    e_pad = rows_ref.shape[0]
    n_tiles = e_pad // edge_tile

    def edge_logits(base):
        # Gather q rows (edge sources) / k rows (edge targets) for one edge tile and compute
        # exp(clip(<q, k>_head)), broadcast over each head's feature block (lane-dense).
        for j in range(edge_tile):
            r = rows_ref[base + j]
            c = cols_ref[base + j]
            gq_ref[pl.ds(j, 1), :] = qn_ref[pl.ds(r, 1), :]
            gk_ref[pl.ds(j, 1), :] = kn_ref[pl.ds(c, 1), :]
        att = jnp.dot(gq_ref[...] * gk_ref[...], hb,
                      preferred_element_type=f32)             # (edge_tile, D)
        att = jnp.clip(att, -10.0, 10.0)
        e_att = jnp.exp(att)
        # zero out padded (fake) edges so they add nothing to the scatter accumulators
        eidx = base + jax.lax.broadcasted_iota(jnp.int32, (edge_tile, 1), 0)
        return jnp.where(eidx < n_edges, e_att, 0.0)

    # ---- pass 1 over edge tiles: softmax denominators, scatter-added per source node
    def pass_denominator(t, carry):
        base = t * edge_tile
        e_att = edge_logits(base)
        for j in range(edge_tile):
            r = rows_ref[base + j]
            norm_ref[pl.ds(r, 1), :] = norm_ref[pl.ds(r, 1), :] + e_att[j:j + 1, :]
        return carry

    jax.lax.fori_loop(0, n_tiles, pass_denominator, 0)

    # ---- pass 2 over edge tiles: normalized attention * v, scatter-added per source node.
    #      Logits are recomputed (O(E*D) flops) so VMEM stays O(N*D), not O(E*D).
    def pass_values(t, carry):
        base = t * edge_tile
        e_att = edge_logits(base)
        for j in range(edge_tile):
            r = rows_ref[base + j]
            c = cols_ref[base + j]
            gv_ref[pl.ds(j, 1), :] = vn_ref[pl.ds(c, 1), :]
            gn_ref[pl.ds(j, 1), :] = norm_ref[pl.ds(r, 1), :]
        att_w = e_att * pl.reciprocal(gn_ref[...] + 1e-8)     # exact reciprocal
        res_e = att_w * gv_ref[...]                           # (edge_tile, D)
        for j in range(edge_tile):
            r = rows_ref[base + j]
            res_ref[pl.ds(r, 1), :] = res_ref[pl.ds(r, 1), :] + res_e[j:j + 1, :]
        return carry

    jax.lax.fori_loop(0, n_tiles, pass_values, 0)

    out = res_ref[...] + emb                                  # residual connection
    if att_norm:                                              # nn.LayerNorm(eps=1e-6)
        mu = jnp.mean(out, axis=-1, keepdims=True)
        var = jnp.mean((out - mu) ** 2, axis=-1, keepdims=True)
        out = (out - mu) * jax.lax.rsqrt(var + 1e-6) * gamma_ref[0] + beta_ref[0]
    emb_ref[...] = out

    # ---- last layer only: output projection (lane-padded -> unmasked stores)
    @pl.when(layer == pl.num_programs(0) - 1)
    def _():
        o_ref[...] = (jnp.dot(out, invw_ref[...], preferred_element_type=f32)
                      + invb_ref[...])


# ---------------------------------------------------------------------------
# Parameter init (mirrors the PyTorch module)
# ---------------------------------------------------------------------------
def xavier_uniform(key, shape):
    fan_in, fan_out = shape
    bound = math.sqrt(6.0 / (fan_in + fan_out))
    return jax.random.uniform(key, shape, jnp.float32, -bound, bound)


def init_params(key, *, gnn_input, att_d_model, gnn_output, gt_layers):
    keys = jax.random.split(key, 6 + 3 * gt_layers)
    params = {
        "W_P_w": xavier_uniform(keys[0], (gnn_input, att_d_model)),
        "W_P_b": jax.random.uniform(keys[1], (att_d_model,), jnp.float32, -0.02, 0.02),
        # pos_encoding('zeros', True, 1, d_model) -> uniform(-0.02, 0.02), (1, D)
        "W_pos": jax.random.uniform(keys[2], (1, att_d_model), jnp.float32, -0.02, 0.02),
        "inver_w": xavier_uniform(keys[3], (att_d_model, gnn_output)),
        "inver_b": jax.random.uniform(keys[4], (gnn_output,), jnp.float32, -0.02, 0.02),
        "layers": [],
    }
    for i in range(gt_layers):
        lk = jax.random.split(keys[5 + i], 3)
        params["layers"].append({
            "qW": xavier_uniform(lk[0], (att_d_model, att_d_model)),
            "kW": xavier_uniform(lk[1], (att_d_model, att_d_model)),
            "vW": xavier_uniform(lk[2], (att_d_model, att_d_model)),
            "gamma": jnp.ones((att_d_model,), jnp.float32),
            "beta": jnp.zeros((att_d_model,), jnp.float32),
        })
    return params


# ---------------------------------------------------------------------------
# Wrapper: builds specs / constants and calls the fused kernel
# ---------------------------------------------------------------------------
def graph_transformer_forward(params, node_features, edge_index, *,
                              att_d_model, head, if_pos, att_norm):
    n = node_features.shape[0]
    e = edge_index.shape[1]
    d = att_d_model
    gnn_input = node_features.shape[1]
    gnn_output = params["inver_w"].shape[1]
    num_layers = len(params["layers"])

    # --- scalar-prefetched edge indices (padded to a multiple of EDGE_TILE) ---
    e_pad = max(EDGE_TILE, _round_up(e, EDGE_TILE))
    rows = jnp.zeros((e_pad,), jnp.int32).at[:e].set(edge_index[0].astype(jnp.int32))
    cols = jnp.zeros((e_pad,), jnp.int32).at[:e].set(edge_index[1].astype(jnp.int32))

    # --- head block-diagonal broadcast matrix: headBcast[i, j] = 1 iff same head ---
    dh = d // head
    head_id = jnp.arange(d) // dh
    head_bcast = (head_id[:, None] == head_id[None, :]).astype(jnp.float32)   # (D, D)

    # --- stacked per-layer weights, streamed one layer-slice per grid step ---
    wq = jnp.stack([lp["qW"] for lp in params["layers"]], axis=0)              # (L, D, D)
    wk = jnp.stack([lp["kW"] for lp in params["layers"]], axis=0)
    wv = jnp.stack([lp["vW"] for lp in params["layers"]], axis=0)
    gamma = jnp.stack([lp["gamma"].reshape(1, d) for lp in params["layers"]], axis=0)
    beta = jnp.stack([lp["beta"].reshape(1, d) for lp in params["layers"]], axis=0)

    bias = params["W_P_b"]
    if if_pos:
        bias = bias + params["W_pos"][0]          # fold positional encoding into the bias
    bias = bias.reshape(1, d)

    # --- lane-dense output: pad gnn_output to a multiple of 128, slice back outside ---
    out_pad = _round_up(gnn_output, LANE)
    invw = jnp.zeros((d, out_pad), jnp.float32).at[:, :gnn_output].set(params["inver_w"])
    invb = jnp.zeros((1, out_pad), jnp.float32).at[:, :gnn_output].set(
        params["inver_b"].reshape(1, gnn_output))

    kern = functools.partial(gt_kernel, n_edges=e, edge_tile=EDGE_TILE, att_norm=att_norm)

    grid_spec = pltpu.PrefetchScalarGridSpec(
        num_scalar_prefetch=2,
        grid=(num_layers,),
        in_specs=[
            pl.BlockSpec((n, gnn_input), lambda l, r, c: (0, 0)),    # x
            pl.BlockSpec((gnn_input, d), lambda l, r, c: (0, 0)),    # W_P
            pl.BlockSpec((1, d), lambda l, r, c: (0, 0)),            # bias (+ pos enc)
            pl.BlockSpec((d, d), lambda l, r, c: (0, 0)),            # headBcast
            pl.BlockSpec((1, d, d), lambda l, r, c: (l, 0, 0)),      # qW[l]
            pl.BlockSpec((1, d, d), lambda l, r, c: (l, 0, 0)),      # kW[l]
            pl.BlockSpec((1, d, d), lambda l, r, c: (l, 0, 0)),      # vW[l]
            pl.BlockSpec((1, 1, d), lambda l, r, c: (l, 0, 0)),      # gamma[l]
            pl.BlockSpec((1, 1, d), lambda l, r, c: (l, 0, 0)),      # beta[l]
            pl.BlockSpec((d, out_pad), lambda l, r, c: (0, 0)),      # inverW (padded)
            pl.BlockSpec((1, out_pad), lambda l, r, c: (0, 0)),      # inverB (padded)
        ],
        out_specs=pl.BlockSpec((n, out_pad), lambda l, r, c: (0, 0)),
        scratch_shapes=[
            pltpu.VMEM((n, d), jnp.float32),           # embeds (persists across layers)
            pltpu.VMEM((n, d), jnp.float32),           # q at node level
            pltpu.VMEM((n, d), jnp.float32),           # k at node level
            pltpu.VMEM((n, d), jnp.float32),           # v at node level
            pltpu.VMEM((n, d), jnp.float32),           # softmax denominators per node
            pltpu.VMEM((n, d), jnp.float32),           # scattered attention output
            pltpu.VMEM((EDGE_TILE, d), jnp.float32),   # gathered q tile
            pltpu.VMEM((EDGE_TILE, d), jnp.float32),   # gathered k tile
            pltpu.VMEM((EDGE_TILE, d), jnp.float32),   # gathered v tile
            pltpu.VMEM((EDGE_TILE, d), jnp.float32),   # gathered denominator tile
        ],
    )

    # --- VMEM budget from the actual buffer set ((8,128) tile padding included) ---
    def tile_bytes(shape):
        shape = tuple(shape)
        lead = 1
        for s in shape[:-2]:
            lead *= s
        sub = _round_up(shape[-2] if len(shape) >= 2 else 1, 8)
        lane = _round_up(shape[-1], LANE)
        return lead * sub * lane * 4

    in_block_shapes = [(n, gnn_input), (gnn_input, d), (1, d), (d, d),
                       (1, d, d), (1, d, d), (1, d, d), (1, 1, d), (1, 1, d),
                       (d, out_pad), (1, out_pad)]
    scratch_block_shapes = [(n, d)] * 6 + [(EDGE_TILE, d)] * 4
    vmem_bytes = (2 * sum(tile_bytes(s) for s in in_block_shapes)      # double-buffered ins
                  + 2 * tile_bytes((n, out_pad))                       # output
                  + sum(tile_bytes(s) for s in scratch_block_shapes))  # scratch
    vmem_limit = int(min(100 * 1024 * 1024, max(vmem_bytes + (4 << 20), 16 << 20)))

    out = pl.pallas_call(
        kern,
        out_shape=jax.ShapeDtypeStruct((n, out_pad), jnp.float32),
        grid_spec=grid_spec,
        compiler_params=pltpu.CompilerParams(
            dimension_semantics=("arbitrary",),       # layers are strictly sequential
            vmem_limit_bytes=vmem_limit),
    )(rows, cols, node_features.astype(jnp.float32), params["W_P_w"], bias,
      head_bcast, wq, wk, wv, gamma, beta, invw, invb)

    return out[:, :gnn_output]


# ---------------------------------------------------------------------------
# Pure-JAX reference (mirrors the PyTorch forward) for validation
# ---------------------------------------------------------------------------
def reference_forward(params, node_features, edge_index, *,
                      att_d_model, head, if_pos, att_norm):
    n = node_features.shape[0]
    rows, cols = edge_index[0], edge_index[1]
    dh = att_d_model // head

    x = node_features.astype(jnp.float32)
    z = x @ params["W_P_w"] + params["W_P_b"]
    embeds = z + params["W_pos"] if if_pos else z

    for lp in params["layers"]:
        rowE = embeds[rows, :]
        colE = embeds[cols, :]
        e = rowE.shape[0]
        q = (rowE @ lp["qW"]).reshape(e, head, dh)
        k = (colE @ lp["kW"]).reshape(e, head, dh)
        v = (colE @ lp["vW"]).reshape(e, head, dh)
        att = jnp.einsum("ehd,ehd->eh", q, k)
        att = jnp.clip(att, -10.0, 10.0)
        expAtt = jnp.exp(att)
        attNorm = jnp.zeros((n, head), jnp.float32).at[rows].add(expAtt)[rows, :]
        att = expAtt / (attNorm + 1e-8)
        res = jnp.einsum("eh,ehd->ehd", att, v).reshape(e, att_d_model)
        res = jnp.zeros((n, att_d_model), jnp.float32).at[rows].add(res)
        res = res + embeds
        if att_norm:
            mu = jnp.mean(res, axis=-1, keepdims=True)
            var = jnp.mean((res - mu) ** 2, axis=-1, keepdims=True)
            res = (res - mu) / jnp.sqrt(var + 1e-6) * lp["gamma"] + lp["beta"]
        embeds = res

    return embeds @ params["inver_w"] + params["inver_b"]


# ---------------------------------------------------------------------------
if __name__ == "__main__":
    # small synthetic config (mirrors args.*)
    N_NODES = 8
    N_EDGES = 16
    GNN_INPUT = 16
    ATT_D_MODEL = 32
    HEAD = 4
    GNN_OUTPUT = 16
    GT_LAYERS = 2
    ATT_NORM = True
    IF_POS = True

    key = jax.random.PRNGKey(0)
    k_feat, k_rows, k_cols, k_params = jax.random.split(key, 4)

    node_features = jax.random.normal(k_feat, (N_NODES, GNN_INPUT), jnp.float32)
    rows = jax.random.randint(k_rows, (N_EDGES,), 0, N_NODES, jnp.int32)
    cols = jax.random.randint(k_cols, (N_EDGES,), 0, N_NODES, jnp.int32)
    edge_index = jnp.stack([rows, cols], axis=0)

    params = init_params(k_params, gnn_input=GNN_INPUT,
                         att_d_model=ATT_D_MODEL, gnn_output=GNN_OUTPUT,
                         gt_layers=GT_LAYERS)

    out = graph_transformer_forward(
        params, node_features, edge_index,
        att_d_model=ATT_D_MODEL, head=HEAD, if_pos=IF_POS, att_norm=ATT_NORM)
    out = jax.block_until_ready(out)

    ref = reference_forward(
        params, node_features, edge_index,
        att_d_model=ATT_D_MODEL, head=HEAD, if_pos=IF_POS, att_norm=ATT_NORM)
    ref = jax.block_until_ready(ref)

    assert out.shape == (N_NODES, GNN_OUTPUT)
    assert jnp.allclose(out, ref, rtol=1e-4, atol=1e-4), "mismatch vs reference"
    print("KERNEL_OK")
</pallas_src>

<mosaic_0001>
module attributes {stable_mosaic.version = 11 : i64} {
  func.func @gt_kernel(%arg0: i32, %arg1: memref<16xi32, #tpu.memory_space<smem>>, %arg2: memref<16xi32, #tpu.memory_space<smem>>, %arg3: memref<8x16xf32, #tpu.memory_space<vmem>>, %arg4: memref<16x32xf32, #tpu.memory_space<vmem>>, %arg5: memref<1x32xf32, #tpu.memory_space<vmem>>, %arg6: memref<32x32xf32, #tpu.memory_space<vmem>>, %arg7: memref<1x32x32xf32, #tpu.memory_space<vmem>>, %arg8: memref<1x32x32xf32, #tpu.memory_space<vmem>>, %arg9: memref<1x32x32xf32, #tpu.memory_space<vmem>>, %arg10: memref<1x1x32xf32, #tpu.memory_space<vmem>>, %arg11: memref<1x1x32xf32, #tpu.memory_space<vmem>>, %arg12: memref<32x128xf32, #tpu.memory_space<vmem>>, %arg13: memref<1x128xf32, #tpu.memory_space<vmem>>, %arg14: memref<8x128xf32, #tpu.memory_space<vmem>>, %arg15: memref<8x32xf32, #tpu.memory_space<vmem>>, %arg16: memref<8x32xf32, #tpu.memory_space<vmem>>, %arg17: memref<8x32xf32, #tpu.memory_space<vmem>>, %arg18: memref<8x32xf32, #tpu.memory_space<vmem>>, %arg19: memref<8x32xf32, #tpu.memory_space<vmem>>, %arg20: memref<8x32xf32, #tpu.memory_space<vmem>>, %arg21: memref<8x32xf32, #tpu.memory_space<vmem>>, %arg22: memref<8x32xf32, #tpu.memory_space<vmem>>, %arg23: memref<8x32xf32, #tpu.memory_space<vmem>>, %arg24: memref<8x32xf32, #tpu.memory_space<vmem>>) attributes {dimension_semantics = [#tpu.dimension_semantics<arbitrary>], iteration_bounds = array<i64: 2>, scalar_prefetch = 2 : i64, scratch_operands = 10 : i64, tpu.core_type = #tpu.core_type<tc>, window_params = [{pipeline_mode = #tpu.pipeline_mode<synchronous>, transform_indices = @transform_0, window_bounds = array<i64: 8, 16>}, {pipeline_mode = #tpu.pipeline_mode<synchronous>, transform_indices = @transform_1, window_bounds = array<i64: 16, 32>}, {pipeline_mode = #tpu.pipeline_mode<synchronous>, transform_indices = @transform_2, window_bounds = array<i64: 1, 32>}, {pipeline_mode = #tpu.pipeline_mode<synchronous>, transform_indices = @transform_3, window_bounds = array<i64: 32, 32>}, {transform_indices = @transform_4, window_bounds = array<i64: 1, 32, 32>}, {transform_indices = @transform_5, window_bounds = array<i64: 1, 32, 32>}, {transform_indices = @transform_6, window_bounds = array<i64: 1, 32, 32>}, {transform_indices = @transform_7, window_bounds = array<i64: 1, 1, 32>}, {transform_indices = @transform_8, window_bounds = array<i64: 1, 1, 32>}, {pipeline_mode = #tpu.pipeline_mode<synchronous>, transform_indices = @transform_9, window_bounds = array<i64: 32, 128>}, {pipeline_mode = #tpu.pipeline_mode<synchronous>, transform_indices = @transform_10, window_bounds = array<i64: 1, 128>}, {pipeline_mode = #tpu.pipeline_mode<synchronous>, transform_indices = @transform_11, window_bounds = array<i64: 8, 128>}]} {
    %c0_i32 = arith.constant 0 : i32
    %0 = arith.cmpi eq, %arg0, %c0_i32 : i32
    %1 = arith.extui %0 : i1 to i32
    %c0_i32_0 = arith.constant 0 : i32
    %2 = arith.cmpi ne, %1, %c0_i32_0 : i32
    scf.if %2 {
      %c0_50 = arith.constant 0 : index
      %c0_51 = arith.constant 0 : index
      %55 = vector.load %arg3[%c0_50, %c0_51] : memref<8x16xf32, #tpu.memory_space<vmem>>, vector<8x16xf32>
      %c0_52 = arith.constant 0 : index
      %c0_53 = arith.constant 0 : index
      %56 = vector.load %arg4[%c0_52, %c0_53] : memref<16x32xf32, #tpu.memory_space<vmem>>, vector<16x32xf32>
      %cst_54 = arith.constant dense<0.000000e+00> : vector<8x32xf32>
      %57 = tpu.matmul %55, %56, %cst_54 {dimension_numbers = #tpu.dot_dimension_numbers<[1], [0], [0], [1], [0, 0, 1, 1], [], []>} : vector<8x16xf32>, vector<16x32xf32>, vector<8x32xf32> -> vector<8x32xf32>
      %c0_55 = arith.constant 0 : index
      %c0_56 = arith.constant 0 : index
      %58 = vector.load %arg5[%c0_55, %c0_56] : memref<1x32xf32, #tpu.memory_space<vmem>>, vector<1x32xf32>
      %59 = vector.broadcast %58 : vector<1x32xf32> to vector<8x32xf32>
      %60 = arith.addf %57, %59 : vector<8x32xf32>
      %c0_57 = arith.constant 0 : index
      %c0_58 = arith.constant 0 : index
      %61 = vector.load %arg15[%c0_57, %c0_58] : memref<8x32xf32, #tpu.memory_space<vmem>>, vector<8x32xf32>
      tpu.vector_store %arg15[%c0_57, %c0_58], %60 {strides = array<i32>} : memref<8x32xf32, #tpu.memory_space<vmem>>, vector<8x32xf32>,
    } else {
    }
    %c0 = arith.constant 0 : index
    %c0_1 = arith.constant 0 : index
    %3 = vector.load %arg15[%c0, %c0_1] : memref<8x32xf32, #tpu.memory_space<vmem>>, vector<8x32xf32>
    %c0_2 = arith.constant 0 : index
    %c0_3 = arith.constant 0 : index
    %c0_4 = arith.constant 0 : index
    %4 = vector.load %arg7[%c0_2, %c0_3, %c0_4] : memref<1x32x32xf32, #tpu.memory_space<vmem>>, vector<1x32x32xf32>
    %5 = vector.shape_cast %4 : vector<1x32x32xf32> to vector<32x32xf32>
    %cst = arith.constant dense<0.000000e+00> : vector<8x32xf32>
    %6 = tpu.matmul %3, %5, %cst {dimension_numbers = #tpu.dot_dimension_numbers<[1], [0], [0], [1], [0, 0, 1, 1], [], []>} : vector<8x32xf32>, vector<32x32xf32>, vector<8x32xf32> -> vector<8x32xf32>
    %c0_5 = arith.constant 0 : index
    %c0_6 = arith.constant 0 : index
    %7 = vector.load %arg16[%c0_5, %c0_6] : memref<8x32xf32, #tpu.memory_space<vmem>>, vector<8x32xf32>
    tpu.vector_store %arg16[%c0_5, %c0_6], %6 {strides = array<i32>} : memref<8x32xf32, #tpu.memory_space<vmem>>, vector<8x32xf32>,
    %c0_7 = arith.constant 0 : index
    %c0_8 = arith.constant 0 : index
    %c0_9 = arith.constant 0 : index
    %8 = vector.load %arg8[%c0_7, %c0_8, %c0_9] : memref<1x32x32xf32, #tpu.memory_space<vmem>>, vector<1x32x32xf32>
    %9 = vector.shape_cast %8 : vector<1x32x32xf32> to vector<32x32xf32>
    %cst_10 = arith.constant dense<0.000000e+00> : vector<8x32xf32>
    %10 = tpu.matmul %3, %9, %cst_10 {dimension_numbers = #tpu.dot_dimension_numbers<[1], [0], [0], [1], [0, 0, 1, 1], [], []>} : vector<8x32xf32>, vector<32x32xf32>, vector<8x32xf32> -> vector<8x32xf32>
    %c0_11 = arith.constant 0 : index
    %c0_12 = arith.constant 0 : index
    %11 = vector.load %arg17[%c0_11, %c0_12] : memref<8x32xf32, #tpu.memory_space<vmem>>, vector<8x32xf32>
    tpu.vector_store %arg17[%c0_11, %c0_12], %10 {strides = array<i32>} : memref<8x32xf32, #tpu.memory_space<vmem>>, vector<8x32xf32>,
    %c0_13 = arith.constant 0 : index
    %c0_14 = arith.constant 0 : index
    %c0_15 = arith.constant 0 : index
    %12 = vector.load %arg9[%c0_13, %c0_14, %c0_15] : memref<1x32x32xf32, #tpu.memory_space<vmem>>, vector<1x32x32xf32>
    %13 = vector.shape_cast %12 : vector<1x32x32xf32> to vector<32x32xf32>
    %cst_16 = arith.constant dense<0.000000e+00> : vector<8x32xf32>
    %14 = tpu.matmul %3, %13, %cst_16 {dimension_numbers = #tpu.dot_dimension_numbers<[1], [0], [0], [1], [0, 0, 1, 1], [], []>} : vector<8x32xf32>, vector<32x32xf32>, vector<8x32xf32> -> vector<8x32xf32>
    %c0_17 = arith.constant 0 : index
    %c0_18 = arith.constant 0 : index
    %15 = vector.load %arg18[%c0_17, %c0_18] : memref<8x32xf32, #tpu.memory_space<vmem>>, vector<8x32xf32>
    tpu.vector_store %arg18[%c0_17, %c0_18], %14 {strides = array<i32>} : memref<8x32xf32, #tpu.memory_space<vmem>>, vector<8x32xf32>,
    %cst_19 = arith.constant 0.000000e+00 : f32
    %16 = vector.broadcast %cst_19 : f32 to vector<8x32xf32>
    %c0_20 = arith.constant 0 : index
    %c0_21 = arith.constant 0 : index
    %17 = vector.load %arg19[%c0_20, %c0_21] : memref<8x32xf32, #tpu.memory_space<vmem>>, vector<8x32xf32>
    tpu.vector_store %arg19[%c0_20, %c0_21], %16 {strides = array<i32>} : memref<8x32xf32, #tpu.memory_space<vmem>>, vector<8x32xf32>,
    %cst_22 = arith.constant 0.000000e+00 : f32
    %18 = vector.broadcast %cst_22 : f32 to vector<8x32xf32>
    %c0_23 = arith.constant 0 : index
    %c0_24 = arith.constant 0 : index
    %19 = vector.load %arg20[%c0_23, %c0_24] : memref<8x32xf32, #tpu.memory_space<vmem>>, vector<8x32xf32>
    tpu.vector_store %arg20[%c0_23, %c0_24], %18 {strides = array<i32>} : memref<8x32xf32, #tpu.memory_space<vmem>>, vector<8x32xf32>,
    %c0_25 = arith.constant 0 : index
    %c0_26 = arith.constant 0 : index
    %20 = vector.load %arg6[%c0_25, %c0_26] : memref<32x32xf32, #tpu.memory_space<vmem>>, vector<32x32xf32>
    %c0_i32_27 = arith.constant 0 : i32
    %c2_i32 = arith.constant 2 : i32
    %21 = arith.addi %c0_i32_27, %c2_i32 : i32
    %c1_i32 = arith.constant 1 : i32
    scf.for %arg25 = %c0_i32_27 to %21 step %c1_i32  : i32 {
      %c8_i32 = arith.constant 8 : i32
      %55 = arith.muli %arg25, %c8_i32 : i32
      %c0_i32_50 = arith.constant 0 : i32
      %56 = arith.addi %55, %c0_i32_50 : i32
      %57 = arith.index_cast %56 : i32 to index
      %58 = memref.load %arg1[%57] : memref<16xi32, #tpu.memory_space<smem>>
      %c0_i32_51 = arith.constant 0 : i32
      %59 = arith.addi %55, %c0_i32_51 : i32
      %60 = arith.index_cast %59 : i32 to index
      %61 = memref.load %arg2[%60] : memref<16xi32, #tpu.memory_space<smem>>
      %62 = arith.index_cast %58 : i32 to index
      %c0_52 = arith.constant 0 : index
      %63 = vector.load %arg16[%62, %c0_52] : memref<8x32xf32, #tpu.memory_space<vmem>>, vector<1x32xf32>
      %c0_53 = arith.constant 0 : index
      %c0_54 = arith.constant 0 : index
      %64 = vector.load %arg21[%c0_53, %c0_54] : memref<8x32xf32, #tpu.memory_space<vmem>>, vector<1x32xf32>
      tpu.vector_store %arg21[%c0_53, %c0_54], %63 {strides = array<i32>} : memref<8x32xf32, #tpu.memory_space<vmem>>, vector<1x32xf32>,
      %65 = arith.index_cast %61 : i32 to index
      %c0_55 = arith.constant 0 : index
      %66 = vector.load %arg17[%65, %c0_55] : memref<8x32xf32, #tpu.memory_space<vmem>>, vector<1x32xf32>
      %c0_56 = arith.constant 0 : index
      %c0_57 = arith.constant 0 : index
      %67 = vector.load %arg22[%c0_56, %c0_57] : memref<8x32xf32, #tpu.memory_space<vmem>>, vector<1x32xf32>
      tpu.vector_store %arg22[%c0_56, %c0_57], %66 {strides = array<i32>} : memref<8x32xf32, #tpu.memory_space<vmem>>, vector<1x32xf32>,
      %c1_i32_58 = arith.constant 1 : i32
      %68 = arith.addi %55, %c1_i32_58 : i32
      %69 = arith.index_cast %68 : i32 to index
      %70 = memref.load %arg1[%69] : memref<16xi32, #tpu.memory_space<smem>>
      %c1_i32_59 = arith.constant 1 : i32
      %71 = arith.addi %55, %c1_i32_59 : i32
      %72 = arith.index_cast %71 : i32 to index
      %73 = memref.load %arg2[%72] : memref<16xi32, #tpu.memory_space<smem>>
      %74 = arith.index_cast %70 : i32 to index
      %c0_60 = arith.constant 0 : index
      %75 = vector.load %arg16[%74, %c0_60] : memref<8x32xf32, #tpu.memory_space<vmem>>, vector<1x32xf32>
      %c1 = arith.constant 1 : index
      %c0_61 = arith.constant 0 : index
      %76 = vector.load %arg21[%c1, %c0_61] : memref<8x32xf32, #tpu.memory_space<vmem>>, vector<1x32xf32>
      tpu.vector_store %arg21[%c1, %c0_61], %75 {strides = array<i32>} : memref<8x32xf32, #tpu.memory_space<vmem>>, vector<1x32xf32>,
      %77 = arith.index_cast %73 : i32 to index
      %c0_62 = arith.constant 0 : index
      %78 = vector.load %arg17[%77, %c0_62] : memref<8x32xf32, #tpu.memory_space<vmem>>, vector<1x32xf32>
      %c1_63 = arith.constant 1 : index
      %c0_64 = arith.constant 0 : index
      %79 = vector.load %arg22[%c1_63, %c0_64] : memref<8x32xf32, #tpu.memory_space<vmem>>, vector<1x32xf32>
      tpu.vector_store %arg22[%c1_63, %c0_64], %78 {strides = array<i32>} : memref<8x32xf32, #tpu.memory_space<vmem>>, vector<1x32xf32>,
      %c2_i32_65 = arith.constant 2 : i32
      %80 = arith.addi %55, %c2_i32_65 : i32
      %81 = arith.index_cast %80 : i32 to index
      %82 = memref.load %arg1[%81] : memref<16xi32, #tpu.memory_space<smem>>
      %c2_i32_66 = arith.constant 2 : i32
      %83 = arith.addi %55, %c2_i32_66 : i32
      %84 = arith.index_cast %83 : i32 to index
      %85 = memref.load %arg2[%84] : memref<16xi32, #tpu.memory_space<smem>>
      %86 = arith.index_cast %82 : i32 to index
      %c0_67 = arith.constant 0 : index
      %87 = vector.load %arg16[%86, %c0_67] : memref<8x32xf32, #tpu.memory_space<vmem>>, vector<1x32xf32>
      %c2 = arith.constant 2 : index
      %c0_68 = arith.constant 0 : index
      %88 = vector.load %arg21[%c2, %c0_68] : memref<8x32xf32, #tpu.memory_space<vmem>>, vector<1x32xf32>
      tpu.vector_store %arg21[%c2, %c0_68], %87 {strides = array<i32>} : memref<8x32xf32, #tpu.memory_space<vmem>>, vector<1x32xf32>,
      %89 = arith.index_cast %85 : i32 to index
      %c0_69 = arith.constant 0 : index
      %90 = vector.load %arg17[%89, %c0_69] : memref<8x32xf32, #tpu.memory_space<vmem>>, vector<1x32xf32>
      %c2_70 = arith.constant 2 : index
      %c0_71 = arith.constant 0 : index
      %91 = vector.load %arg22[%c2_70, %c0_71] : memref<8x32xf32, #tpu.memory_space<vmem>>, vector<1x32xf32>
      tpu.vector_store %arg22[%c2_70, %c0_71], %90 {strides = array<i32>} : memref<8x32xf32, #tpu.memory_space<vmem>>, vector<1x32xf32>,
      %c3_i32 = arith.constant 3 : i32
      %92 = arith.addi %55, %c3_i32 : i32
      %93 = arith.index_cast %92 : i32 to index
      %94 = memref.load %arg1[%93] : memref<16xi32, #tpu.memory_space<smem>>
      %c3_i32_72 = arith.constant 3 : i32
      %95 = arith.addi %55, %c3_i32_72 : i32
      %96 = arith.index_cast %95 : i32 to index
      %97 = memref.load %arg2[%96] : memref<16xi32, #tpu.memory_space<smem>>
      %98 = arith.index_cast %94 : i32 to index
      %c0_73 = arith.constant 0 : index
      %99 = vector.load %arg16[%98, %c0_73] : memref<8x32xf32, #tpu.memory_space<vmem>>, vector<1x32xf32>
      %c3 = arith.constant 3 : index
      %c0_74 = arith.constant 0 : index
      %100 = vector.load %arg21[%c3, %c0_74] : memref<8x32xf32, #tpu.memory_space<vmem>>, vector<1x32xf32>
      tpu.vector_store %arg21[%c3, %c0_74], %99 {strides = array<i32>} : memref<8x32xf32, #tpu.memory_space<vmem>>, vector<1x32xf32>,
      %101 = arith.index_cast %97 : i32 to index
      %c0_75 = arith.constant 0 : index
      %102 = vector.load %arg17[%101, %c0_75] : memref<8x32xf32, #tpu.memory_space<vmem>>, vector<1x32xf32>
      %c3_76 = arith.constant 3 : index
      %c0_77 = arith.constant 0 : index
      %103 = vector.load %arg22[%c3_76, %c0_77] : memref<8x32xf32, #tpu.memory_space<vmem>>, vector<1x32xf32>
      tpu.vector_store %arg22[%c3_76, %c0_77], %102 {strides = array<i32>} : memref<8x32xf32, #tpu.memory_space<vmem>>, vector<1x32xf32>,
      %c4_i32 = arith.constant 4 : i32
      %104 = arith.addi %55, %c4_i32 : i32
      %105 = arith.index_cast %104 : i32 to index
      %106 = memref.load %arg1[%105] : memref<16xi32, #tpu.memory_space<smem>>
      %c4_i32_78 = arith.constant 4 : i32
      %107 = arith.addi %55, %c4_i32_78 : i32
      %108 = arith.index_cast %107 : i32 to index
      %109 = memref.load %arg2[%108] : memref<16xi32, #tpu.memory_space<smem>>
      %110 = arith.index_cast %106 : i32 to index
      %c0_79 = arith.constant 0 : index
      %111 = vector.load %arg16[%110, %c0_79] : memref<8x32xf32, #tpu.memory_space<vmem>>, vector<1x32xf32>
      %c4 = arith.constant 4 : index
      %c0_80 = arith.constant 0 : index
      %112 = vector.load %arg21[%c4, %c0_80] : memref<8x32xf32, #tpu.memory_space<vmem>>, vector<1x32xf32>
      tpu.vector_store %arg21[%c4, %c0_80], %111 {strides = array<i32>} : memref<8x32xf32, #tpu.memory_space<vmem>>, vector<1x32xf32>,
      %113 = arith.index_cast %109 : i32 to index
      %c0_81 = arith.constant 0 : index
      %114 = vector.load %arg17[%113, %c0_81] : memref<8x32xf32, #tpu.memory_space<vmem>>, vector<1x32xf32>
      %c4_82 = arith.constant 4 : index
      %c0_83 = arith.constant 0 : index
      %115 = vector.load %arg22[%c4_82, %c0_83] : memref<8x32xf32, #tpu.memory_space<vmem>>, vector<1x32xf32>
      tpu.vector_store %arg22[%c4_82, %c0_83], %114 {strides = array<i32>} : memref<8x32xf32, #tpu.memory_space<vmem>>, vector<1x32xf32>,
      %c5_i32 = arith.constant 5 : i32
      %116 = arith.addi %55, %c5_i32 : i32
      %117 = arith.index_cast %116 : i32 to index
      %118 = memref.load %arg1[%117] : memref<16xi32, #tpu.memory_space<smem>>
      %c5_i32_84 = arith.constant 5 : i32
      %119 = arith.addi %55, %c5_i32_84 : i32
      %120 = arith.index_cast %119 : i32 to index
      %121 = memref.load %arg2[%120] : memref<16xi32, #tpu.memory_space<smem>>
      %122 = arith.index_cast %118 : i32 to index
      %c0_85 = arith.constant 0 : index
      %123 = vector.load %arg16[%122, %c0_85] : memref<8x32xf32, #tpu.memory_space<vmem>>, vector<1x32xf32>
      %c5 = arith.constant 5 : index
      %c0_86 = arith.constant 0 : index
      %124 = vector.load %arg21[%c5, %c0_86] : memref<8x32xf32, #tpu.memory_space<vmem>>, vector<1x32xf32>
      tpu.vector_store %arg21[%c5, %c0_86], %123 {strides = array<i32>} : memref<8x32xf32, #tpu.memory_space<vmem>>, vector<1x32xf32>,
      %125 = arith.index_cast %121 : i32 to index
      %c0_87 = arith.constant 0 : index
      %126 = vector.load %arg17[%125, %c0_87] : memref<8x32xf32, #tpu.memory_space<vmem>>, vector<1x32xf32>
      %c5_88 = arith.constant 5 : index
      %c0_89 = arith.constant 0 : index
      %127 = vector.load %arg22[%c5_88, %c0_89] : memref<8x32xf32, #tpu.memory_space<vmem>>, vector<1x32xf32>
      tpu.vector_store %arg22[%c5_88, %c0_89], %126 {strides = array<i32>} : memref<8x32xf32, #tpu.memory_space<vmem>>, vector<1x32xf32>,
      %c6_i32 = arith.constant 6 : i32
      %128 = arith.addi %55, %c6_i32 : i32
      %129 = arith.index_cast %128 : i32 to index
      %130 = memref.load %arg1[%129] : memref<16xi32, #tpu.memory_space<smem>>
      %c6_i32_90 = arith.constant 6 : i32
      %131 = arith.addi %55, %c6_i32_90 : i32
      %132 = arith.index_cast %131 : i32 to index
      %133 = memref.load %arg2[%132] : memref<16xi32, #tpu.memory_space<smem>>
      %134 = arith.index_cast %130 : i32 to index
      %c0_91 = arith.constant 0 : index
      %135 = vector.load %arg16[%134, %c0_91] : memref<8x32xf32, #tpu.memory_space<vmem>>, vector<1x32xf32>
      %c6 = arith.constant 6 : index
      %c0_92 = arith.constant 0 : index
      %136 = vector.load %arg21[%c6, %c0_92] : memref<8x32xf32, #tpu.memory_space<vmem>>, vector<1x32xf32>
      tpu.vector_store %arg21[%c6, %c0_92], %135 {strides = array<i32>} : memref<8x32xf32, #tpu.memory_space<vmem>>, vector<1x32xf32>,
      %137 = arith.index_cast %133 : i32 to index
      %c0_93 = arith.constant 0 : index
      %138 = vector.load %arg17[%137, %c0_93] : memref<8x32xf32, #tpu.memory_space<vmem>>, vector<1x32xf32>
      %c6_94 = arith.constant 6 : index
      %c0_95 = arith.constant 0 : index
      %139 = vector.load %arg22[%c6_94, %c0_95] : memref<8x32xf32, #tpu.memory_space<vmem>>, vector<1x32xf32>
      tpu.vector_store %arg22[%c6_94, %c0_95], %138 {strides = array<i32>} : memref<8x32xf32, #tpu.memory_space<vmem>>, vector<1x32xf32>,
      %c7_i32 = arith.constant 7 : i32
      %140 = arith.addi %55, %c7_i32 : i32
      %141 = arith.index_cast %140 : i32 to index
      %142 = memref.load %arg1[%141] : memref<16xi32, #tpu.memory_space<smem>>
      %c7_i32_96 = arith.constant 7 : i32
      %143 = arith.addi %55, %c7_i32_96 : i32
      %144 = arith.index_cast %143 : i32 to index
      %145 = memref.load %arg2[%144] : memref<16xi32, #tpu.memory_space<smem>>
      %146 = arith.index_cast %142 : i32 to index
      %c0_97 = arith.constant 0 : index
      %147 = vector.load %arg16[%146, %c0_97] : memref<8x32xf32, #tpu.memory_space<vmem>>, vector<1x32xf32>
      %c7 = arith.constant 7 : index
      %c0_98 = arith.constant 0 : index
      %148 = vector.load %arg21[%c7, %c0_98] : memref<8x32xf32, #tpu.memory_space<vmem>>, vector<1x32xf32>
      tpu.vector_store %arg21[%c7, %c0_98], %147 {strides = array<i32>} : memref<8x32xf32, #tpu.memory_space<vmem>>, vector<1x32xf32>,
      %149 = arith.index_cast %145 : i32 to index
      %c0_99 = arith.constant 0 : index
      %150 = vector.load %arg17[%149, %c0_99] : memref<8x32xf32, #tpu.memory_space<vmem>>, vector<1x32xf32>
      %c7_100 = arith.constant 7 : index
      %c0_101 = arith.constant 0 : index
      %151 = vector.load %arg22[%c7_100, %c0_101] : memref<8x32xf32, #tpu.memory_space<vmem>>, vector<1x32xf32>
      tpu.vector_store %arg22[%c7_100, %c0_101], %150 {strides = array<i32>} : memref<8x32xf32, #tpu.memory_space<vmem>>, vector<1x32xf32>,
      %c0_102 = arith.constant 0 : index
      %c0_103 = arith.constant 0 : index
      %152 = vector.load %arg21[%c0_102, %c0_103] : memref<8x32xf32, #tpu.memory_space<vmem>>, vector<8x32xf32>
      %c0_104 = arith.constant 0 : index
      %c0_105 = arith.constant 0 : index
      %153 = vector.load %arg22[%c0_104, %c0_105] : memref<8x32xf32, #tpu.memory_space<vmem>>, vector<8x32xf32>
      %154 = arith.mulf %152, %153 : vector<8x32xf32>
      %cst_106 = arith.constant dense<0.000000e+00> : vector<8x32xf32>
      %155 = tpu.matmul %154, %20, %cst_106 {dimension_numbers = #tpu.dot_dimension_numbers<[1], [0], [0], [1], [0, 0, 1, 1], [], []>} : vector<8x32xf32>, vector<32x32xf32>, vector<8x32xf32> -> vector<8x32xf32>
      %cst_107 = arith.constant -1.000000e+01 : f32
      %cst_108 = arith.constant 1.000000e+01 : f32
      %156 = vector.broadcast %cst_107 : f32 to vector<8x32xf32>
      %157 = arith.maximumf %156, %155 : vector<8x32xf32>
      %158 = vector.broadcast %cst_108 : f32 to vector<8x32xf32>
      %159 = arith.minimumf %158, %157 : vector<8x32xf32>
      %160 = math.exp %159 : vector<8x32xf32>
      %161 = tpu.iota {dimensions = array<i32: 0>} : vector<8x1xi32>
      %162 = vector.broadcast %55 : i32 to vector<8x1xi32>
      %163 = arith.addi %162, %161 : vector<8x1xi32>
      %c16_i32 = arith.constant 16 : i32
      %164 = vector.broadcast %c16_i32 : i32 to vector<8x1xi32>
      %165 = arith.cmpi slt, %163, %164 : vector<8x1xi32>
      %cst_109 = arith.constant 0.000000e+00 : f32
      %166 = vector.shape_cast %165 : vector<8x1xi1> to vector<8x1xi1>
      %167 = vector.broadcast %166 : vector<8x1xi1> to vector<8x32xi1>
      %168 = vector.broadcast %cst_109 : f32 to vector<8x32xf32>
      %169 = arith.select %167, %160, %168 : vector<8x32xi1>, vector<8x32xf32>
      %c0_i32_110 = arith.constant 0 : i32
      %170 = arith.addi %55, %c0_i32_110 : i32
      %171 = arith.index_cast %170 : i32 to index
      %172 = memref.load %arg1[%171] : memref<16xi32, #tpu.memory_space<smem>>
      %173 = arith.index_cast %172 : i32 to index
      %c0_111 = arith.constant 0 : index
      %174 = vector.load %arg19[%173, %c0_111] : memref<8x32xf32, #tpu.memory_space<vmem>>, vector<1x32xf32>
      %175 = vector.extract_strided_slice %169 {offsets = [0, 0], sizes = [1, 32], strides = [1, 1]} : vector<8x32xf32> to vector<1x32xf32>
      %176 = arith.addf %174, %175 : vector<1x32xf32>
      %177 = arith.index_cast %172 : i32 to index
      %c0_112 = arith.constant 0 : index
      %178 = vector.load %arg19[%177, %c0_112] : memref<8x32xf32, #tpu.memory_space<vmem>>, vector<1x32xf32>
      tpu.vector_store %arg19[%177, %c0_112], %176 {strides = array<i32>} : memref<8x32xf32, #tpu.memory_space<vmem>>, vector<1x32xf32>,
      %c1_i32_113 = arith.constant 1 : i32
      %179 = arith.addi %55, %c1_i32_113 : i32
      %180 = arith.index_cast %179 : i32 to index
      %181 = memref.load %arg1[%180] : memref<16xi32, #tpu.memory_space<smem>>
      %182 = arith.index_cast %181 : i32 to index
      %c0_114 = arith.constant 0 : index
      %183 = vector.load %arg19[%182, %c0_114] : memref<8x32xf32, #tpu.memory_space<vmem>>, vector<1x32xf32>
      %184 = vector.extract_strided_slice %169 {offsets = [1, 0], sizes = [1, 32], strides = [1, 1]} : vector<8x32xf32> to vector<1x32xf32>
      %185 = arith.addf %183, %184 : vector<1x32xf32>
      %186 = arith.index_cast %181 : i32 to index
      %c0_115 = arith.constant 0 : index
      %187 = vector.load %arg19[%186, %c0_115] : memref<8x32xf32, #tpu.memory_space<vmem>>, vector<1x32xf32>
      tpu.vector_store %arg19[%186, %c0_115], %185 {strides = array<i32>} : memref<8x32xf32, #tpu.memory_space<vmem>>, vector<1x32xf32>,
      %c2_i32_116 = arith.constant 2 : i32
      %188 = arith.addi %55, %c2_i32_116 : i32
      %189 = arith.index_cast %188 : i32 to index
      %190 = memref.load %arg1[%189] : memref<16xi32, #tpu.memory_space<smem>>
      %191 = arith.index_cast %190 : i32 to index
      %c0_117 = arith.constant 0 : index
      %192 = vector.load %arg19[%191, %c0_117] : memref<8x32xf32, #tpu.memory_space<vmem>>, vector<1x32xf32>
      %193 = vector.extract_strided_slice %169 {offsets = [2, 0], sizes = [1, 32], strides = [1, 1]} : vector<8x32xf32> to vector<1x32xf32>
      %194 = arith.addf %192, %193 : vector<1x32xf32>
      %195 = arith.index_cast %190 : i32 to index
      %c0_118 = arith.constant 0 : index
      %196 = vector.load %arg19[%195, %c0_118] : memref<8x32xf32, #tpu.memory_space<vmem>>, vector<1x32xf32>
      tpu.vector_store %arg19[%195, %c0_118], %194 {strides = array<i32>} : memref<8x32xf32, #tpu.memory_space<vmem>>, vector<1x32xf32>,
      %c3_i32_119 = arith.constant 3 : i32
      %197 = arith.addi %55, %c3_i32_119 : i32
      %198 = arith.index_cast %197 : i32 to index
      %199 = memref.load %arg1[%198] : memref<16xi32, #tpu.memory_space<smem>>
      %200 = arith.index_cast %199 : i32 to index
      %c0_120 = arith.constant 0 : index
      %201 = vector.load %arg19[%200, %c0_120] : memref<8x32xf32, #tpu.memory_space<vmem>>, vector<1x32xf32>
      %202 = vector.extract_strided_slice %169 {offsets = [3, 0], sizes = [1, 32], strides = [1, 1]} : vector<8x32xf32> to vector<1x32xf32>
      %203 = arith.addf %201, %202 : vector<1x32xf32>
      %204 = arith.index_cast %199 : i32 to index
      %c0_121 = arith.constant 0 : index
      %205 = vector.load %arg19[%204, %c0_121] : memref<8x32xf32, #tpu.memory_space<vmem>>, vector<1x32xf32>
      tpu.vector_store %arg19[%204, %c0_121], %203 {strides = array<i32>} : memref<8x32xf32, #tpu.memory_space<vmem>>, vector<1x32xf32>,
      %c4_i32_122 = arith.constant 4 : i32
      %206 = arith.addi %55, %c4_i32_122 : i32
      %207 = arith.index_cast %206 : i32 to index
      %208 = memref.load %arg1[%207] : memref<16xi32, #tpu.memory_space<smem>>
      %209 = arith.index_cast %208 : i32 to index
      %c0_123 = arith.constant 0 : index
      %210 = vector.load %arg19[%209, %c0_123] : memref<8x32xf32, #tpu.memory_space<vmem>>, vector<1x32xf32>
      %211 = vector.extract_strided_slice %169 {offsets = [4, 0], sizes = [1, 32], strides = [1, 1]} : vector<8x32xf32> to vector<1x32xf32>
      %212 = arith.addf %210, %211 : vector<1x32xf32>
      %213 = arith.index_cast %208 : i32 to index
      %c0_124 = arith.constant 0 : index
      %214 = vector.load %arg19[%213, %c0_124] : memref<8x32xf32, #tpu.memory_space<vmem>>, vector<1x32xf32>
      tpu.vector_store %arg19[%213, %c0_124], %212 {strides = array<i32>} : memref<8x32xf32, #tpu.memory_space<vmem>>, vector<1x32xf32>,
      %c5_i32_125 = arith.constant 5 : i32
      %215 = arith.addi %55, %c5_i32_125 : i32
      %216 = arith.index_cast %215 : i32 to index
      %217 = memref.load %arg1[%216] : memref<16xi32, #tpu.memory_space<smem>>
      %218 = arith.index_cast %217 : i32 to index
      %c0_126 = arith.constant 0 : index
      %219 = vector.load %arg19[%218, %c0_126] : memref<8x32xf32, #tpu.memory_space<vmem>>, vector<1x32xf32>
      %220 = vector.extract_strided_slice %169 {offsets = [5, 0], sizes = [1, 32], strides = [1, 1]} : vector<8x32xf32> to vector<1x32xf32>
      %221 = arith.addf %219, %220 : vector<1x32xf32>
      %222 = arith.index_cast %217 : i32 to index
      %c0_127 = arith.constant 0 : index
      %223 = vector.load %arg19[%222, %c0_127] : memref<8x32xf32, #tpu.memory_space<vmem>>, vector<1x32xf32>
      tpu.vector_store %arg19[%222, %c0_127], %221 {strides = array<i32>} : memref<8x32xf32, #tpu.memory_space<vmem>>, vector<1x32xf32>,
      %c6_i32_128 = arith.constant 6 : i32
      %224 = arith.addi %55, %c6_i32_128 : i32
      %225 = arith.index_cast %224 : i32 to index
      %226 = memref.load %arg1[%225] : memref<16xi32, #tpu.memory_space<smem>>
      %227 = arith.index_cast %226 : i32 to index
      %c0_129 = arith.constant 0 : index
      %228 = vector.load %arg19[%227, %c0_129] : memref<8x32xf32, #tpu.memory_space<vmem>>, vector<1x32xf32>
      %229 = vector.extract_strided_slice %169 {offsets = [6, 0], sizes = [1, 32], strides = [1, 1]} : vector<8x32xf32> to vector<1x32xf32>
      %230 = arith.addf %228, %229 : vector<1x32xf32>
      %231 = arith.index_cast %226 : i32 to index
      %c0_130 = arith.constant 0 : index
      %232 = vector.load %arg19[%231, %c0_130] : memref<8x32xf32, #tpu.memory_space<vmem>>, vector<1x32xf32>
      tpu.vector_store %arg19[%231, %c0_130], %230 {strides = array<i32>} : memref<8x32xf32, #tpu.memory_space<vmem>>, vector<1x32xf32>,
      %c7_i32_131 = arith.constant 7 : i32
      %233 = arith.addi %55, %c7_i32_131 : i32
      %234 = arith.index_cast %233 : i32 to index
      %235 = memref.load %arg1[%234] : memref<16xi32, #tpu.memory_space<smem>>
      %236 = arith.index_cast %235 : i32 to index
      %c0_132 = arith.constant 0 : index
      %237 = vector.load %arg19[%236, %c0_132] : memref<8x32xf32, #tpu.memory_space<vmem>>, vector<1x32xf32>
      %238 = vector.extract_strided_slice %169 {offsets = [7, 0], sizes = [1, 32], strides = [1, 1]} : vector<8x32xf32> to vector<1x32xf32>
      %239 = arith.addf %237, %238 : vector<1x32xf32>
      %240 = arith.index_cast %235 : i32 to index
      %c0_133 = arith.constant 0 : index
      %241 = vector.load %arg19[%240, %c0_133] : memref<8x32xf32, #tpu.memory_space<vmem>>, vector<1x32xf32>
      tpu.vector_store %arg19[%240, %c0_133], %239 {strides = array<i32>} : memref<8x32xf32, #tpu.memory_space<vmem>>, vector<1x32xf32>,
    }
    %c2_i32_28 = arith.constant 2 : i32
    %c0_i32_29 = arith.constant 0 : i32
    %c2_i32_30 = arith.constant 2 : i32
    %22 = arith.addi %c0_i32_29, %c2_i32_30 : i32
    %c1_i32_31 = arith.constant 1 : i32
    scf.for %arg25 = %c0_i32_29 to %22 step %c1_i32_31  : i32 {
      %c8_i32 = arith.constant 8 : i32
      %55 = arith.muli %arg25, %c8_i32 : i32
      %c0_i32_50 = arith.constant 0 : i32
      %56 = arith.addi %55, %c0_i32_50 : i32
      %57 = arith.index_cast %56 : i32 to index
      %58 = memref.load %arg1[%57] : memref<16xi32, #tpu.memory_space<smem>>
      %c0_i32_51 = arith.constant 0 : i32
      %59 = arith.addi %55, %c0_i32_51 : i32
      %60 = arith.index_cast %59 : i32 to index
      %61 = memref.load %arg2[%60] : memref<16xi32, #tpu.memory_space<smem>>
      %62 = arith.index_cast %58 : i32 to index
      %c0_52 = arith.constant 0 : index
      %63 = vector.load %arg16[%62, %c0_52] : memref<8x32xf32, #tpu.memory_space<vmem>>, vector<1x32xf32>
      %c0_53 = arith.constant 0 : index
      %c0_54 = arith.constant 0 : index
      %64 = vector.load %arg21[%c0_53, %c0_54] : memref<8x32xf32, #tpu.memory_space<vmem>>, vector<1x32xf32>
      tpu.vector_store %arg21[%c0_53, %c0_54], %63 {strides = array<i32>} : memref<8x32xf32, #tpu.memory_space<vmem>>, vector<1x32xf32>,
      %65 = arith.index_cast %61 : i32 to index
      %c0_55 = arith.constant 0 : index
      %66 = vector.load %arg17[%65, %c0_55] : memref<8x32xf32, #tpu.memory_space<vmem>>, vector<1x32xf32>
      %c0_56 = arith.constant 0 : index
      %c0_57 = arith.constant 0 : index
      %67 = vector.load %arg22[%c0_56, %c0_57] : memref<8x32xf32, #tpu.memory_space<vmem>>, vector<1x32xf32>
      tpu.vector_store %arg22[%c0_56, %c0_57], %66 {strides = array<i32>} : memref<8x32xf32, #tpu.memory_space<vmem>>, vector<1x32xf32>,
      %c1_i32_58 = arith.constant 1 : i32
      %68 = arith.addi %55, %c1_i32_58 : i32
      %69 = arith.index_cast %68 : i32 to index
      %70 = memref.load %arg1[%69] : memref<16xi32, #tpu.memory_space<smem>>
      %c1_i32_59 = arith.constant 1 : i32
      %71 = arith.addi %55, %c1_i32_59 : i32
      %72 = arith.index_cast %71 : i32 to index
      %73 = memref.load %arg2[%72] : memref<16xi32, #tpu.memory_space<smem>>
      %74 = arith.index_cast %70 : i32 to index
      %c0_60 = arith.constant 0 : index
      %75 = vector.load %arg16[%74, %c0_60] : memref<8x32xf32, #tpu.memory_space<vmem>>, vector<1x32xf32>
      %c1 = arith.constant 1 : index
      %c0_61 = arith.constant 0 : index
      %76 = vector.load %arg21[%c1, %c0_61] : memref<8x32xf32, #tpu.memory_space<vmem>>, vector<1x32xf32>
      tpu.vector_store %arg21[%c1, %c0_61], %75 {strides = array<i32>} : memref<8x32xf32, #tpu.memory_space<vmem>>, vector<1x32xf32>,
      %77 = arith.index_cast %73 : i32 to index
      %c0_62 = arith.constant 0 : index
      %78 = vector.load %arg17[%77, %c0_62] : memref<8x32xf32, #tpu.memory_space<vmem>>, vector<1x32xf32>
      %c1_63 = arith.constant 1 : index
      %c0_64 = arith.constant 0 : index
      %79 = vector.load %arg22[%c1_63, %c0_64] : memref<8x32xf32, #tpu.memory_space<vmem>>, vector<1x32xf32>
      tpu.vector_store %arg22[%c1_63, %c0_64], %78 {strides = array<i32>} : memref<8x32xf32, #tpu.memory_space<vmem>>, vector<1x32xf32>,
      %c2_i32_65 = arith.constant 2 : i32
      %80 = arith.addi %55, %c2_i32_65 : i32
      %81 = arith.index_cast %80 : i32 to index
      %82 = memref.load %arg1[%81] : memref<16xi32, #tpu.memory_space<smem>>
      %c2_i32_66 = arith.constant 2 : i32
      %83 = arith.addi %55, %c2_i32_66 : i32
      %84 = arith.index_cast %83 : i32 to index
      %85 = memref.load %arg2[%84] : memref<16xi32, #tpu.memory_space<smem>>
      %86 = arith.index_cast %82 : i32 to index
      %c0_67 = arith.constant 0 : index
      %87 = vector.load %arg16[%86, %c0_67] : memref<8x32xf32, #tpu.memory_space<vmem>>, vector<1x32xf32>
      %c2 = arith.constant 2 : index
      %c0_68 = arith.constant 0 : index
      %88 = vector.load %arg21[%c2, %c0_68] : memref<8x32xf32, #tpu.memory_space<vmem>>, vector<1x32xf32>
      tpu.vector_store %arg21[%c2, %c0_68], %87 {strides = array<i32>} : memref<8x32xf32, #tpu.memory_space<vmem>>, vector<1x32xf32>,
      %89 = arith.index_cast %85 : i32 to index
      %c0_69 = arith.constant 0 : index
      %90 = vector.load %arg17[%89, %c0_69] : memref<8x32xf32, #tpu.memory_space<vmem>>, vector<1x32xf32>
      %c2_70 = arith.constant 2 : index
      %c0_71 = arith.constant 0 : index
      %91 = vector.load %arg22[%c2_70, %c0_71] : memref<8x32xf32, #tpu.memory_space<vmem>>, vector<1x32xf32>
      tpu.vector_store %arg22[%c2_70, %c0_71], %90 {strides = array<i32>} : memref<8x32xf32, #tpu.memory_space<vmem>>, vector<1x32xf32>,
      %c3_i32 = arith.constant 3 : i32
      %92 = arith.addi %55, %c3_i32 : i32
      %93 = arith.index_cast %92 : i32 to index
      %94 = memref.load %arg1[%93] : memref<16xi32, #tpu.memory_space<smem>>
      %c3_i32_72 = arith.constant 3 : i32
      %95 = arith.addi %55, %c3_i32_72 : i32
      %96 = arith.index_cast %95 : i32 to index
      %97 = memref.load %arg2[%96] : memref<16xi32, #tpu.memory_space<smem>>
      %98 = arith.index_cast %94 : i32 to index
      %c0_73 = arith.constant 0 : index
      %99 = vector.load %arg16[%98, %c0_73] : memref<8x32xf32, #tpu.memory_space<vmem>>, vector<1x32xf32>
      %c3 = arith.constant 3 : index
      %c0_74 = arith.constant 0 : index
      %100 = vector.load %arg21[%c3, %c0_74] : memref<8x32xf32, #tpu.memory_space<vmem>>, vector<1x32xf32>
      tpu.vector_store %arg21[%c3, %c0_74], %99 {strides = array<i32>} : memref<8x32xf32, #tpu.memory_space<vmem>>, vector<1x32xf32>,
      %101 = arith.index_cast %97 : i32 to index
      %c0_75 = arith.constant 0 : index
      %102 = vector.load %arg17[%101, %c0_75] : memref<8x32xf32, #tpu.memory_space<vmem>>, vector<1x32xf32>
      %c3_76 = arith.constant 3 : index
      %c0_77 = arith.constant 0 : index
      %103 = vector.load %arg22[%c3_76, %c0_77] : memref<8x32xf32, #tpu.memory_space<vmem>>, vector<1x32xf32>
      tpu.vector_store %arg22[%c3_76, %c0_77], %102 {strides = array<i32>} : memref<8x32xf32, #tpu.memory_space<vmem>>, vector<1x32xf32>,
      %c4_i32 = arith.constant 4 : i32
      %104 = arith.addi %55, %c4_i32 : i32
      %105 = arith.index_cast %104 : i32 to index
      %106 = memref.load %arg1[%105] : memref<16xi32, #tpu.memory_space<smem>>
      %c4_i32_78 = arith.constant 4 : i32
      %107 = arith.addi %55, %c4_i32_78 : i32
      %108 = arith.index_cast %107 : i32 to index
      %109 = memref.load %arg2[%108] : memref<16xi32, #tpu.memory_space<smem>>
      %110 = arith.index_cast %106 : i32 to index
      %c0_79 = arith.constant 0 : index
      %111 = vector.load %arg16[%110, %c0_79] : memref<8x32xf32, #tpu.memory_space<vmem>>, vector<1x32xf32>
      %c4 = arith.constant 4 : index
      %c0_80 = arith.constant 0 : index
      %112 = vector.load %arg21[%c4, %c0_80] : memref<8x32xf32, #tpu.memory_space<vmem>>, vector<1x32xf32>
      tpu.vector_store %arg21[%c4, %c0_80], %111 {strides = array<i32>} : memref<8x32xf32, #tpu.memory_space<vmem>>, vector<1x32xf32>,
      %113 = arith.index_cast %109 : i32 to index
      %c0_81 = arith.constant 0 : index
      %114 = vector.load %arg17[%113, %c0_81] : memref<8x32xf32, #tpu.memory_space<vmem>>, vector<1x32xf32>
      %c4_82 = arith.constant 4 : index
      %c0_83 = arith.constant 0 : index
      %115 = vector.load %arg22[%c4_82, %c0_83] : memref<8x32xf32, #tpu.memory_space<vmem>>, vector<1x32xf32>
      tpu.vector_store %arg22[%c4_82, %c0_83], %114 {strides = array<i32>} : memref<8x32xf32, #tpu.memory_space<vmem>>, vector<1x32xf32>,
      %c5_i32 = arith.constant 5 : i32
      %116 = arith.addi %55, %c5_i32 : i32
      %117 = arith.index_cast %116 : i32 to index
      %118 = memref.load %arg1[%117] : memref<16xi32, #tpu.memory_space<smem>>
      %c5_i32_84 = arith.constant 5 : i32
      %119 = arith.addi %55, %c5_i32_84 : i32
      %120 = arith.index_cast %119 : i32 to index
      %121 = memref.load %arg2[%120] : memref<16xi32, #tpu.memory_space<smem>>
      %122 = arith.index_cast %118 : i32 to index
      %c0_85 = arith.constant 0 : index
      %123 = vector.load %arg16[%122, %c0_85] : memref<8x32xf32, #tpu.memory_space<vmem>>, vector<1x32xf32>
      %c5 = arith.constant 5 : index
      %c0_86 = arith.constant 0 : index
      %124 = vector.load %arg21[%c5, %c0_86] : memref<8x32xf32, #tpu.memory_space<vmem>>, vector<1x32xf32>
      tpu.vector_store %arg21[%c5, %c0_86], %123 {strides = array<i32>} : memref<8x32xf32, #tpu.memory_space<vmem>>, vector<1x32xf32>,
      %125 = arith.index_cast %121 : i32 to index
      %c0_87 = arith.constant 0 : index
      %126 = vector.load %arg17[%125, %c0_87] : memref<8x32xf32, #tpu.memory_space<vmem>>, vector<1x32xf32>
      %c5_88 = arith.constant 5 : index
      %c0_89 = arith.constant 0 : index
      %127 = vector.load %arg22[%c5_88, %c0_89] : memref<8x32xf32, #tpu.memory_space<vmem>>, vector<1x32xf32>
      tpu.vector_store %arg22[%c5_88, %c0_89], %126 {strides = array<i32>} : memref<8x32xf32, #tpu.memory_space<vmem>>, vector<1x32xf32>,
      %c6_i32 = arith.constant 6 : i32
      %128 = arith.addi %55, %c6_i32 : i32
      %129 = arith.index_cast %128 : i32 to index
      %130 = memref.load %arg1[%129] : memref<16xi32, #tpu.memory_space<smem>>
      %c6_i32_90 = arith.constant 6 : i32
      %131 = arith.addi %55, %c6_i32_90 : i32
      %132 = arith.index_cast %131 : i32 to index
      %133 = memref.load %arg2[%132] : memref<16xi32, #tpu.memory_space<smem>>
      %134 = arith.index_cast %130 : i32 to index
      %c0_91 = arith.constant 0 : index
      %135 = vector.load %arg16[%134, %c0_91] : memref<8x32xf32, #tpu.memory_space<vmem>>, vector<1x32xf32>
      %c6 = arith.constant 6 : index
      %c0_92 = arith.constant 0 : index
      %136 = vector.load %arg21[%c6, %c0_92] : memref<8x32xf32, #tpu.memory_space<vmem>>, vector<1x32xf32>
      tpu.vector_store %arg21[%c6, %c0_92], %135 {strides = array<i32>} : memref<8x32xf32, #tpu.memory_space<vmem>>, vector<1x32xf32>,
      %137 = arith.index_cast %133 : i32 to index
      %c0_93 = arith.constant 0 : index
      %138 = vector.load %arg17[%137, %c0_93] : memref<8x32xf32, #tpu.memory_space<vmem>>, vector<1x32xf32>
      %c6_94 = arith.constant 6 : index
      %c0_95 = arith.constant 0 : index
      %139 = vector.load %arg22[%c6_94, %c0_95] : memref<8x32xf32, #tpu.memory_space<vmem>>, vector<1x32xf32>
      tpu.vector_store %arg22[%c6_94, %c0_95], %138 {strides = array<i32>} : memref<8x32xf32, #tpu.memory_space<vmem>>, vector<1x32xf32>,
      %c7_i32 = arith.constant 7 : i32
      %140 = arith.addi %55, %c7_i32 : i32
      %141 = arith.index_cast %140 : i32 to index
      %142 = memref.load %arg1[%141] : memref<16xi32, #tpu.memory_space<smem>>
      %c7_i32_96 = arith.constant 7 : i32
      %143 = arith.addi %55, %c7_i32_96 : i32
      %144 = arith.index_cast %143 : i32 to index
      %145 = memref.load %arg2[%144] : memref<16xi32, #tpu.memory_space<smem>>
      %146 = arith.index_cast %142 : i32 to index
      %c0_97 = arith.constant 0 : index
      %147 = vector.load %arg16[%146, %c0_97] : memref<8x32xf32, #tpu.memory_space<vmem>>, vector<1x32xf32>
      %c7 = arith.constant 7 : index
      %c0_98 = arith.constant 0 : index
      %148 = vector.load %arg21[%c7, %c0_98] : memref<8x32xf32, #tpu.memory_space<vmem>>, vector<1x32xf32>
      tpu.vector_store %arg21[%c7, %c0_98], %147 {strides = array<i32>} : memref<8x32xf32, #tpu.memory_space<vmem>>, vector<1x32xf32>,
      %149 = arith.index_cast %145 : i32 to index
      %c0_99 = arith.constant 0 : index
      %150 = vector.load %arg17[%149, %c0_99] : memref<8x32xf32, #tpu.memory_space<vmem>>, vector<1x32xf32>
      %c7_100 = arith.constant 7 : index
      %c0_101 = arith.constant 0 : index
      %151 = vector.load %arg22[%c7_100, %c0_101] : memref<8x32xf32, #tpu.memory_space<vmem>>, vector<1x32xf32>
      tpu.vector_store %arg22[%c7_100, %c0_101], %150 {strides = array<i32>} : memref<8x32xf32, #tpu.memory_space<vmem>>, vector<1x32xf32>,
      %c0_102 = arith.constant 0 : index
      %c0_103 = arith.constant 0 : index
      %152 = vector.load %arg21[%c0_102, %c0_103] : memref<8x32xf32, #tpu.memory_space<vmem>>, vector<8x32xf32>
      %c0_104 = arith.constant 0 : index
      %c0_105 = arith.constant 0 : index
      %153 = vector.load %arg22[%c0_104, %c0_105] : memref<8x32xf32, #tpu.memory_space<vmem>>, vector<8x32xf32>
      %154 = arith.mulf %152, %153 : vector<8x32xf32>
      %cst_106 = arith.constant dense<0.000000e+00> : vector<8x32xf32>
      %155 = tpu.matmul %154, %20, %cst_106 {dimension_numbers = #tpu.dot_dimension_numbers<[1], [0], [0], [1], [0, 0, 1, 1], [], []>} : vector<8x32xf32>, vector<32x32xf32>, vector<8x32xf32> -> vector<8x32xf32>
      %cst_107 = arith.constant -1.000000e+01 : f32
      %cst_108 = arith.constant 1.000000e+01 : f32
      %156 = vector.broadcast %cst_107 : f32 to vector<8x32xf32>
      %157 = arith.maximumf %156, %155 : vector<8x32xf32>
      %158 = vector.broadcast %cst_108 : f32 to vector<8x32xf32>
      %159 = arith.minimumf %158, %157 : vector<8x32xf32>
      %160 = math.exp %159 : vector<8x32xf32>
      %161 = tpu.iota {dimensions = array<i32: 0>} : vector<8x1xi32>
      %162 = vector.broadcast %55 : i32 to vector<8x1xi32>
      %163 = arith.addi %162, %161 : vector<8x1xi32>
      %c16_i32 = arith.constant 16 : i32
      %164 = vector.broadcast %c16_i32 : i32 to vector<8x1xi32>
      %165 = arith.cmpi slt, %163, %164 : vector<8x1xi32>
      %cst_109 = arith.constant 0.000000e+00 : f32
      %166 = vector.shape_cast %165 : vector<8x1xi1> to vector<8x1xi1>
      %167 = vector.broadcast %166 : vector<8x1xi1> to vector<8x32xi1>
      %168 = vector.broadcast %cst_109 : f32 to vector<8x32xf32>
      %169 = arith.select %167, %160, %168 : vector<8x32xi1>, vector<8x32xf32>
      %c0_i32_110 = arith.constant 0 : i32
      %170 = arith.addi %55, %c0_i32_110 : i32
      %171 = arith.index_cast %170 : i32 to index
      %172 = memref.load %arg1[%171] : memref<16xi32, #tpu.memory_space<smem>>
      %c0_i32_111 = arith.constant 0 : i32
      %173 = arith.addi %55, %c0_i32_111 : i32
      %174 = arith.index_cast %173 : i32 to index
      %175 = memref.load %arg2[%174] : memref<16xi32, #tpu.memory_space<smem>>
      %176 = arith.index_cast %175 : i32 to index
      %c0_112 = arith.constant 0 : index
      %177 = vector.load %arg18[%176, %c0_112] : memref<8x32xf32, #tpu.memory_space<vmem>>, vector<1x32xf32>
      %c0_113 = arith.constant 0 : index
      %c0_114 = arith.constant 0 : index
      %178 = vector.load %arg23[%c0_113, %c0_114] : memref<8x32xf32, #tpu.memory_space<vmem>>, vector<1x32xf32>
      tpu.vector_store %arg23[%c0_113, %c0_114], %177 {strides = array<i32>} : memref<8x32xf32, #tpu.memory_space<vmem>>, vector<1x32xf32>,
      %179 = arith.index_cast %172 : i32 to index
      %c0_115 = arith.constant 0 : index
      %180 = vector.load %arg19[%179, %c0_115] : memref<8x32xf32, #tpu.memory_space<vmem>>, vector<1x32xf32>
      %c0_116 = arith.constant 0 : index
      %c0_117 = arith.constant 0 : index
      %181 = vector.load %arg24[%c0_116, %c0_117] : memref<8x32xf32, #tpu.memory_space<vmem>>, vector<1x32xf32>
      tpu.vector_store %arg24[%c0_116, %c0_117], %180 {strides = array<i32>} : memref<8x32xf32, #tpu.memory_space<vmem>>, vector<1x32xf32>,
      %c1_i32_118 = arith.constant 1 : i32
      %182 = arith.addi %55, %c1_i32_118 : i32
      %183 = arith.index_cast %182 : i32 to index
      %184 = memref.load %arg1[%183] : memref<16xi32, #tpu.memory_space<smem>>
      %c1_i32_119 = arith.constant 1 : i32
      %185 = arith.addi %55, %c1_i32_119 : i32
      %186 = arith.index_cast %185 : i32 to index
      %187 = memref.load %arg2[%186] : memref<16xi32, #tpu.memory_space<smem>>
      %188 = arith.index_cast %187 : i32 to index
      %c0_120 = arith.constant 0 : index
      %189 = vector.load %arg18[%188, %c0_120] : memref<8x32xf32, #tpu.memory_space<vmem>>, vector<1x32xf32>
      %c1_121 = arith.constant 1 : index
      %c0_122 = arith.constant 0 : index
      %190 = vector.load %arg23[%c1_121, %c0_122] : memref<8x32xf32, #tpu.memory_space<vmem>>, vector<1x32xf32>
      tpu.vector_store %arg23[%c1_121, %c0_122], %189 {strides = array<i32>} : memref<8x32xf32, #tpu.memory_space<vmem>>, vector<1x32xf32>,
      %191 = arith.index_cast %184 : i32 to index
      %c0_123 = arith.constant 0 : index
      %192 = vector.load %arg19[%191, %c0_123] : memref<8x32xf32, #tpu.memory_space<vmem>>, vector<1x32xf32>
      %c1_124 = arith.constant 1 : index
      %c0_125 = arith.constant 0 : index
      %193 = vector.load %arg24[%c1_124, %c0_125] : memref<8x32xf32, #tpu.memory_space<vmem>>, vector<1x32xf32>
      tpu.vector_store %arg24[%c1_124, %c0_125], %192 {strides = array<i32>} : memref<8x32xf32, #tpu.memory_space<vmem>>, vector<1x32xf32>,
      %c2_i32_126 = arith.constant 2 : i32
      %194 = arith.addi %55, %c2_i32_126 : i32
      %195 = arith.index_cast %194 : i32 to index
      %196 = memref.load %arg1[%195] : memref<16xi32, #tpu.memory_space<smem>>
      %c2_i32_127 = arith.constant 2 : i32
      %197 = arith.addi %55, %c2_i32_127 : i32
      %198 = arith.index_cast %197 : i32 to index
      %199 = memref.load %arg2[%198] : memref<16xi32, #tpu.memory_space<smem>>
      %200 = arith.index_cast %199 : i32 to index
      %c0_128 = arith.constant 0 : index
      %201 = vector.load %arg18[%200, %c0_128] : memref<8x32xf32, #tpu.memory_space<vmem>>, vector<1x32xf32>
      %c2_129 = arith.constant 2 : index
      %c0_130 = arith.constant 0 : index
      %202 = vector.load %arg23[%c2_129, %c0_130] : memref<8x32xf32, #tpu.memory_space<vmem>>, vector<1x32xf32>
      tpu.vector_store %arg23[%c2_129, %c0_130], %201 {strides = array<i32>} : memref<8x32xf32, #tpu.memory_space<vmem>>, vector<1x32xf32>,
      %203 = arith.index_cast %196 : i32 to index
      %c0_131 = arith.constant 0 : index
      %204 = vector.load %arg19[%203, %c0_131] : memref<8x32xf32, #tpu.memory_space<vmem>>, vector<1x32xf32>
      %c2_132 = arith.constant 2 : index
      %c0_133 = arith.constant 0 : index
      %205 = vector.load %arg24[%c2_132, %c0_133] : memref<8x32xf32, #tpu.memory_space<vmem>>, vector<1x32xf32>
      tpu.vector_store %arg24[%c2_132, %c0_133], %204 {strides = array<i32>} : memref<8x32xf32, #tpu.memory_space<vmem>>, vector<1x32xf32>,
      %c3_i32_134 = arith.constant 3 : i32
      %206 = arith.addi %55, %c3_i32_134 : i32
      %207 = arith.index_cast %206 : i32 to index
      %208 = memref.load %arg1[%207] : memref<16xi32, #tpu.memory_space<smem>>
      %c3_i32_135 = arith.constant 3 : i32
      %209 = arith.addi %55, %c3_i32_135 : i32
      %210 = arith.index_cast %209 : i32 to index
      %211 = memref.load %arg2[%210] : memref<16xi32, #tpu.memory_space<smem>>
      %212 = arith.index_cast %211 : i32 to index
      %c0_136 = arith.constant 0 : index
      %213 = vector.load %arg18[%212, %c0_136] : memref<8x32xf32, #tpu.memory_space<vmem>>, vector<1x32xf32>
      %c3_137 = arith.constant 3 : index
      %c0_138 = arith.constant 0 : index
      %214 = vector.load %arg23[%c3_137, %c0_138] : memref<8x32xf32, #tpu.memory_space<vmem>>, vector<1x32xf32>
      tpu.vector_store %arg23[%c3_137, %c0_138], %213 {strides = array<i32>} : memref<8x32xf32, #tpu.memory_space<vmem>>, vector<1x32xf32>,
      %215 = arith.index_cast %208 : i32 to index
      %c0_139 = arith.constant 0 : index
      %216 = vector.load %arg19[%215, %c0_139] : memref<8x32xf32, #tpu.memory_space<vmem>>, vector<1x32xf32>
      %c3_140 = arith.constant 3 : index
      %c0_141 = arith.constant 0 : index
      %217 = vector.load %arg24[%c3_140, %c0_141] : memref<8x32xf32, #tpu.memory_space<vmem>>, vector<1x32xf32>
      tpu.vector_store %arg24[%c3_140, %c0_141], %216 {strides = array<i32>} : memref<8x32xf32, #tpu.memory_space<vmem>>, vector<1x32xf32>,
      %c4_i32_142 = arith.constant 4 : i32
      %218 = arith.addi %55, %c4_i32_142 : i32
      %219 = arith.index_cast %218 : i32 to index
      %220 = memref.load %arg1[%219] : memref<16xi32, #tpu.memory_space<smem>>
      %c4_i32_143 = arith.constant 4 : i32
      %221 = arith.addi %55, %c4_i32_143 : i32
      %222 = arith.index_cast %221 : i32 to index
      %223 = memref.load %arg2[%222] : memref<16xi32, #tpu.memory_space<smem>>
      %224 = arith.index_cast %223 : i32 to index
      %c0_144 = arith.constant 0 : index
      %225 = vector.load %arg18[%224, %c0_144] : memref<8x32xf32, #tpu.memory_space<vmem>>, vector<1x32xf32>
      %c4_145 = arith.constant 4 : index
      %c0_146 = arith.constant 0 : index
      %226 = vector.load %arg23[%c4_145, %c0_146] : memref<8x32xf32, #tpu.memory_space<vmem>>, vector<1x32xf32>
      tpu.vector_store %arg23[%c4_145, %c0_146], %225 {strides = array<i32>} : memref<8x32xf32, #tpu.memory_space<vmem>>, vector<1x32xf32>,
      %227 = arith.index_cast %220 : i32 to index
      %c0_147 = arith.constant 0 : index
      %228 = vector.load %arg19[%227, %c0_147] : memref<8x32xf32, #tpu.memory_space<vmem>>, vector<1x32xf32>
      %c4_148 = arith.constant 4 : index
      %c0_149 = arith.constant 0 : index
      %229 = vector.load %arg24[%c4_148, %c0_149] : memref<8x32xf32, #tpu.memory_space<vmem>>, vector<1x32xf32>
      tpu.vector_store %arg24[%c4_148, %c0_149], %228 {strides = array<i32>} : memref<8x32xf32, #tpu.memory_space<vmem>>, vector<1x32xf32>,
      %c5_i32_150 = arith.constant 5 : i32
      %230 = arith.addi %55, %c5_i32_150 : i32
      %231 = arith.index_cast %230 : i32 to index
      %232 = memref.load %arg1[%231] : memref<16xi32, #tpu.memory_space<smem>>
      %c5_i32_151 = arith.constant 5 : i32
      %233 = arith.addi %55, %c5_i32_151 : i32
      %234 = arith.index_cast %233 : i32 to index
      %235 = memref.load %arg2[%234] : memref<16xi32, #tpu.memory_space<smem>>
      %236 = arith.index_cast %235 : i32 to index
      %c0_152 = arith.constant 0 : index
      %237 = vector.load %arg18[%236, %c0_152] : memref<8x32xf32, #tpu.memory_space<vmem>>, vector<1x32xf32>
      %c5_153 = arith.constant 5 : index
      %c0_154 = arith.constant 0 : index
      %238 = vector.load %arg23[%c5_153, %c0_154] : memref<8x32xf32, #tpu.memory_space<vmem>>, vector<1x32xf32>
      tpu.vector_store %arg23[%c5_153, %c0_154], %237 {strides = array<i32>} : memref<8x32xf32, #tpu.memory_space<vmem>>, vector<1x32xf32>,
      %239 = arith.index_cast %232 : i32 to index
      %c0_155 = arith.constant 0 : index
      %240 = vector.load %arg19[%239, %c0_155] : memref<8x32xf32, #tpu.memory_space<vmem>>, vector<1x32xf32>
      %c5_156 = arith.constant 5 : index
      %c0_157 = arith.constant 0 : index
      %241 = vector.load %arg24[%c5_156, %c0_157] : memref<8x32xf32, #tpu.memory_space<vmem>>, vector<1x32xf32>
      tpu.vector_store %arg24[%c5_156, %c0_157], %240 {strides = array<i32>} : memref<8x32xf32, #tpu.memory_space<vmem>>, vector<1x32xf32>,
      %c6_i32_158 = arith.constant 6 : i32
      %242 = arith.addi %55, %c6_i32_158 : i32
      %243 = arith.index_cast %242 : i32 to index
      %244 = memref.load %arg1[%243] : memref<16xi32, #tpu.memory_space<smem>>
      %c6_i32_159 = arith.constant 6 : i32
      %245 = arith.addi %55, %c6_i32_159 : i32
      %246 = arith.index_cast %245 : i32 to index
      %247 = memref.load %arg2[%246] : memref<16xi32, #tpu.memory_space<smem>>
      %248 = arith.index_cast %247 : i32 to index
      %c0_160 = arith.constant 0 : index
      %249 = vector.load %arg18[%248, %c0_160] : memref<8x32xf32, #tpu.memory_space<vmem>>, vector<1x32xf32>
      %c6_161 = arith.constant 6 : index
      %c0_162 = arith.constant 0 : index
      %250 = vector.load %arg23[%c6_161, %c0_162] : memref<8x32xf32, #tpu.memory_space<vmem>>, vector<1x32xf32>
      tpu.vector_store %arg23[%c6_161, %c0_162], %249 {strides = array<i32>} : memref<8x32xf32, #tpu.memory_space<vmem>>, vector<1x32xf32>,
      %251 = arith.index_cast %244 : i32 to index
      %c0_163 = arith.constant 0 : index
      %252 = vector.load %arg19[%251, %c0_163] : memref<8x32xf32, #tpu.memory_space<vmem>>, vector<1x32xf32>
      %c6_164 = arith.constant 6 : index
      %c0_165 = arith.constant 0 : index
      %253 = vector.load %arg24[%c6_164, %c0_165] : memref<8x32xf32, #tpu.memory_space<vmem>>, vector<1x32xf32>
      tpu.vector_store %arg24[%c6_164, %c0_165], %252 {strides = array<i32>} : memref<8x32xf32, #tpu.memory_space<vmem>>, vector<1x32xf32>,
      %c7_i32_166 = arith.constant 7 : i32
      %254 = arith.addi %55, %c7_i32_166 : i32
      %255 = arith.index_cast %254 : i32 to index
      %256 = memref.load %arg1[%255] : memref<16xi32, #tpu.memory_space<smem>>
      %c7_i32_167 = arith.constant 7 : i32
      %257 = arith.addi %55, %c7_i32_167 : i32
      %258 = arith.index_cast %257 : i32 to index
      %259 = memref.load %arg2[%258] : memref<16xi32, #tpu.memory_space<smem>>
      %260 = arith.index_cast %259 : i32 to index
      %c0_168 = arith.constant 0 : index
      %261 = vector.load %arg18[%260, %c0_168] : memref<8x32xf32, #tpu.memory_space<vmem>>, vector<1x32xf32>
      %c7_169 = arith.constant 7 : index
      %c0_170 = arith.constant 0 : index
      %262 = vector.load %arg23[%c7_169, %c0_170] : memref<8x32xf32, #tpu.memory_space<vmem>>, vector<1x32xf32>
      tpu.vector_store %arg23[%c7_169, %c0_170], %261 {strides = array<i32>} : memref<8x32xf32, #tpu.memory_space<vmem>>, vector<1x32xf32>,
      %263 = arith.index_cast %256 : i32 to index
      %c0_171 = arith.constant 0 : index
      %264 = vector.load %arg19[%263, %c0_171] : memref<8x32xf32, #tpu.memory_space<vmem>>, vector<1x32xf32>
      %c7_172 = arith.constant 7 : index
      %c0_173 = arith.constant 0 : index
      %265 = vector.load %arg24[%c7_172, %c0_173] : memref<8x32xf32, #tpu.memory_space<vmem>>, vector<1x32xf32>
      tpu.vector_store %arg24[%c7_172, %c0_173], %264 {strides = array<i32>} : memref<8x32xf32, #tpu.memory_space<vmem>>, vector<1x32xf32>,
      %c0_174 = arith.constant 0 : index
      %c0_175 = arith.constant 0 : index
      %266 = vector.load %arg24[%c0_174, %c0_175] : memref<8x32xf32, #tpu.memory_space<vmem>>, vector<8x32xf32>
      %cst_176 = arith.constant 9.99999993E-9 : f32
      %267 = vector.broadcast %cst_176 : f32 to vector<8x32xf32>
      %268 = arith.addf %266, %267 : vector<8x32xf32>
      %269 = tpu.reciprocal %268 : vector<8x32xf32> -> vector<8x32xf32>
      %270 = arith.mulf %169, %269 : vector<8x32xf32>
      %c0_177 = arith.constant 0 : index
      %c0_178 = arith.constant 0 : index
      %271 = vector.load %arg23[%c0_177, %c0_178] : memref<8x32xf32, #tpu.memory_space<vmem>>, vector<8x32xf32>
      %272 = arith.mulf %270, %271 : vector<8x32xf32>
      %c0_i32_179 = arith.constant 0 : i32
      %273 = arith.addi %55, %c0_i32_179 : i32
      %274 = arith.index_cast %273 : i32 to index
      %275 = memref.load %arg1[%274] : memref<16xi32, #tpu.memory_space<smem>>
      %276 = arith.index_cast %275 : i32 to index
      %c0_180 = arith.constant 0 : index
      %277 = vector.load %arg20[%276, %c0_180] : memref<8x32xf32, #tpu.memory_space<vmem>>, vector<1x32xf32>
      %278 = vector.extract_strided_slice %272 {offsets = [0, 0], sizes = [1, 32], strides = [1, 1]} : vector<8x32xf32> to vector<1x32xf32>
      %279 = arith.addf %277, %278 : vector<1x32xf32>
      %280 = arith.index_cast %275 : i32 to index
      %c0_181 = arith.constant 0 : index
      %281 = vector.load %arg20[%280, %c0_181] : memref<8x32xf32, #tpu.memory_space<vmem>>, vector<1x32xf32>
      tpu.vector_store %arg20[%280, %c0_181], %279 {strides = array<i32>} : memref<8x32xf32, #tpu.memory_space<vmem>>, vector<1x32xf32>,
      %c1_i32_182 = arith.constant 1 : i32
      %282 = arith.addi %55, %c1_i32_182 : i32
      %283 = arith.index_cast %282 : i32 to index
      %284 = memref.load %arg1[%283] : memref<16xi32, #tpu.memory_space<smem>>
      %285 = arith.index_cast %284 : i32 to index
      %c0_183 = arith.constant 0 : index
      %286 = vector.load %arg20[%285, %c0_183] : memref<8x32xf32, #tpu.memory_space<vmem>>, vector<1x32xf32>
      %287 = vector.extract_strided_slice %272 {offsets = [1, 0], sizes = [1, 32], strides = [1, 1]} : vector<8x32xf32> to vector<1x32xf32>
      %288 = arith.addf %286, %287 : vector<1x32xf32>
      %289 = arith.index_cast %284 : i32 to index
      %c0_184 = arith.constant 0 : index
      %290 = vector.load %arg20[%289, %c0_184] : memref<8x32xf32, #tpu.memory_space<vmem>>, vector<1x32xf32>
      tpu.vector_store %arg20[%289, %c0_184], %288 {strides = array<i32>} : memref<8x32xf32, #tpu.memory_space<vmem>>, vector<1x32xf32>,
      %c2_i32_185 = arith.constant 2 : i32
      %291 = arith.addi %55, %c2_i32_185 : i32
      %292 = arith.index_cast %291 : i32 to index
      %293 = memref.load %arg1[%292] : memref<16xi32, #tpu.memory_space<smem>>
      %294 = arith.index_cast %293 : i32 to index
      %c0_186 = arith.constant 0 : index
      %295 = vector.load %arg20[%294, %c0_186] : memref<8x32xf32, #tpu.memory_space<vmem>>, vector<1x32xf32>
      %296 = vector.extract_strided_slice %272 {offsets = [2, 0], sizes = [1, 32], strides = [1, 1]} : vector<8x32xf32> to vector<1x32xf32>
      %297 = arith.addf %295, %296 : vector<1x32xf32>
      %298 = arith.index_cast %293 : i32 to index
      %c0_187 = arith.constant 0 : index
      %299 = vector.load %arg20[%298, %c0_187] : memref<8x32xf32, #tpu.memory_space<vmem>>, vector<1x32xf32>
      tpu.vector_store %arg20[%298, %c0_187], %297 {strides = array<i32>} : memref<8x32xf32, #tpu.memory_space<vmem>>, vector<1x32xf32>,
      %c3_i32_188 = arith.constant 3 : i32
      %300 = arith.addi %55, %c3_i32_188 : i32
      %301 = arith.index_cast %300 : i32 to index
      %302 = memref.load %arg1[%301] : memref<16xi32, #tpu.memory_space<smem>>
      %303 = arith.index_cast %302 : i32 to index
      %c0_189 = arith.constant 0 : index
      %304 = vector.load %arg20[%303, %c0_189] : memref<8x32xf32, #tpu.memory_space<vmem>>, vector<1x32xf32>
      %305 = vector.extract_strided_slice %272 {offsets = [3, 0], sizes = [1, 32], strides = [1, 1]} : vector<8x32xf32> to vector<1x32xf32>
      %306 = arith.addf %304, %305 : vector<1x32xf32>
      %307 = arith.index_cast %302 : i32 to index
      %c0_190 = arith.constant 0 : index
      %308 = vector.load %arg20[%307, %c0_190] : memref<8x32xf32, #tpu.memory_space<vmem>>, vector<1x32xf32>
      tpu.vector_store %arg20[%307, %c0_190], %306 {strides = array<i32>} : memref<8x32xf32, #tpu.memory_space<vmem>>, vector<1x32xf32>,
      %c4_i32_191 = arith.constant 4 : i32
      %309 = arith.addi %55, %c4_i32_191 : i32
      %310 = arith.index_cast %309 : i32 to index
      %311 = memref.load %arg1[%310] : memref<16xi32, #tpu.memory_space<smem>>
      %312 = arith.index_cast %311 : i32 to index
      %c0_192 = arith.constant 0 : index
      %313 = vector.load %arg20[%312, %c0_192] : memref<8x32xf32, #tpu.memory_space<vmem>>, vector<1x32xf32>
      %314 = vector.extract_strided_slice %272 {offsets = [4, 0], sizes = [1, 32], strides = [1, 1]} : vector<8x32xf32> to vector<1x32xf32>
      %315 = arith.addf %313, %314 : vector<1x32xf32>
      %316 = arith.index_cast %311 : i32 to index
      %c0_193 = arith.constant 0 : index
      %317 = vector.load %arg20[%316, %c0_193] : memref<8x32xf32, #tpu.memory_space<vmem>>, vector<1x32xf32>
      tpu.vector_store %arg20[%316, %c0_193], %315 {strides = array<i32>} : memref<8x32xf32, #tpu.memory_space<vmem>>, vector<1x32xf32>,
      %c5_i32_194 = arith.constant 5 : i32
      %318 = arith.addi %55, %c5_i32_194 : i32
      %319 = arith.index_cast %318 : i32 to index
      %320 = memref.load %arg1[%319] : memref<16xi32, #tpu.memory_space<smem>>
      %321 = arith.index_cast %320 : i32 to index
      %c0_195 = arith.constant 0 : index
      %322 = vector.load %arg20[%321, %c0_195] : memref<8x32xf32, #tpu.memory_space<vmem>>, vector<1x32xf32>
      %323 = vector.extract_strided_slice %272 {offsets = [5, 0], sizes = [1, 32], strides = [1, 1]} : vector<8x32xf32> to vector<1x32xf32>
      %324 = arith.addf %322, %323 : vector<1x32xf32>
      %325 = arith.index_cast %320 : i32 to index
      %c0_196 = arith.constant 0 : index
      %326 = vector.load %arg20[%325, %c0_196] : memref<8x32xf32, #tpu.memory_space<vmem>>, vector<1x32xf32>
      tpu.vector_store %arg20[%325, %c0_196], %324 {strides = array<i32>} : memref<8x32xf32, #tpu.memory_space<vmem>>, vector<1x32xf32>,
      %c6_i32_197 = arith.constant 6 : i32
      %327 = arith.addi %55, %c6_i32_197 : i32
      %328 = arith.index_cast %327 : i32 to index
      %329 = memref.load %arg1[%328] : memref<16xi32, #tpu.memory_space<smem>>
      %330 = arith.index_cast %329 : i32 to index
      %c0_198 = arith.constant 0 : index
      %331 = vector.load %arg20[%330, %c0_198] : memref<8x32xf32, #tpu.memory_space<vmem>>, vector<1x32xf32>
      %332 = vector.extract_strided_slice %272 {offsets = [6, 0], sizes = [1, 32], strides = [1, 1]} : vector<8x32xf32> to vector<1x32xf32>
      %333 = arith.addf %331, %332 : vector<1x32xf32>
      %334 = arith.index_cast %329 : i32 to index
      %c0_199 = arith.constant 0 : index
      %335 = vector.load %arg20[%334, %c0_199] : memref<8x32xf32, #tpu.memory_space<vmem>>, vector<1x32xf32>
      tpu.vector_store %arg20[%334, %c0_199], %333 {strides = array<i32>} : memref<8x32xf32, #tpu.memory_space<vmem>>, vector<1x32xf32>,
      %c7_i32_200 = arith.constant 7 : i32
      %336 = arith.addi %55, %c7_i32_200 : i32
      %337 = arith.index_cast %336 : i32 to index
      %338 = memref.load %arg1[%337] : memref<16xi32, #tpu.memory_space<smem>>
      %339 = arith.index_cast %338 : i32 to index
      %c0_201 = arith.constant 0 : index
      %340 = vector.load %arg20[%339, %c0_201] : memref<8x32xf32, #tpu.memory_space<vmem>>, vector<1x32xf32>
      %341 = vector.extract_strided_slice %272 {offsets = [7, 0], sizes = [1, 32], strides = [1, 1]} : vector<8x32xf32> to vector<1x32xf32>
      %342 = arith.addf %340, %341 : vector<1x32xf32>
      %343 = arith.index_cast %338 : i32 to index
      %c0_202 = arith.constant 0 : index
      %344 = vector.load %arg20[%343, %c0_202] : memref<8x32xf32, #tpu.memory_space<vmem>>, vector<1x32xf32>
      tpu.vector_store %arg20[%343, %c0_202], %342 {strides = array<i32>} : memref<8x32xf32, #tpu.memory_space<vmem>>, vector<1x32xf32>,
    }
    %c2_i32_32 = arith.constant 2 : i32
    %c0_33 = arith.constant 0 : index
    %c0_34 = arith.constant 0 : index
    %23 = vector.load %arg20[%c0_33, %c0_34] : memref<8x32xf32, #tpu.memory_space<vmem>>, vector<8x32xf32>
    %24 = arith.addf %23, %3 : vector<8x32xf32>
    %cst_35 = arith.constant dense<0.000000e+00> : vector<8xf32>
    %25 = vector.multi_reduction <add>, %24, %cst_35 [1] : vector<8x32xf32> to vector<8xf32>
    %26 = vector.shape_cast %25 : vector<8xf32> to vector<8x1xf32>
    %cst_36 = arith.constant 3.200000e+01 : f32
    %27 = vector.broadcast %cst_36 : f32 to vector<8x1xf32>
    %28 = arith.divf %26, %27 : vector<8x1xf32>
    %29 = vector.broadcast %28 : vector<8x1xf32> to vector<8x32xf32>
    %30 = arith.subf %24, %29 : vector<8x32xf32>
    %31 = arith.mulf %30, %30 : vector<8x32xf32>
    %cst_37 = arith.constant dense<0.000000e+00> : vector<8xf32>
    %32 = vector.multi_reduction <add>, %31, %cst_37 [1] : vector<8x32xf32> to vector<8xf32>
    %33 = vector.shape_cast %32 : vector<8xf32> to vector<8x1xf32>
    %cst_38 = arith.constant 3.200000e+01 : f32
    %34 = vector.broadcast %cst_38 : f32 to vector<8x1xf32>
    %35 = arith.divf %33, %34 : vector<8x1xf32>
    %36 = vector.broadcast %28 : vector<8x1xf32> to vector<8x32xf32>
    %37 = arith.subf %24, %36 : vector<8x32xf32>
    %cst_39 = arith.constant 9.99999997E-7 : f32
    %38 = vector.broadcast %cst_39 : f32 to vector<8x1xf32>
    %39 = arith.addf %35, %38 : vector<8x1xf32>
    %40 = math.rsqrt %39 : vector<8x1xf32>
    %41 = vector.broadcast %40 : vector<8x1xf32> to vector<8x32xf32>
    %42 = arith.mulf %37, %41 : vector<8x32xf32>
    %c0_40 = arith.constant 0 : index
    %c0_41 = arith.constant 0 : index
    %c0_42 = arith.constant 0 : index
    %43 = vector.load %arg10[%c0_40, %c0_41, %c0_42] : memref<1x1x32xf32, #tpu.memory_space<vmem>>, vector<1x1x32xf32>
    %44 = vector.shape_cast %43 : vector<1x1x32xf32> to vector<1x32xf32>
    %45 = vector.broadcast %44 : vector<1x32xf32> to vector<8x32xf32>
    %46 = arith.mulf %42, %45 : vector<8x32xf32>
    %c0_43 = arith.constant 0 : index
    %c0_44 = arith.constant 0 : index
    %c0_45 = arith.constant 0 : index
    %47 = vector.load %arg11[%c0_43, %c0_44, %c0_45] : memref<1x1x32xf32, #tpu.memory_space<vmem>>, vector<1x1x32xf32>
    %48 = vector.shape_cast %47 : vector<1x1x32xf32> to vector<1x32xf32>
    %49 = vector.broadcast %48 : vector<1x32xf32> to vector<8x32xf32>
    %50 = arith.addf %46, %49 : vector<8x32xf32>
    %c0_46 = arith.constant 0 : index
    %c0_47 = arith.constant 0 : index
    %51 = vector.load %arg15[%c0_46, %c0_47] : memref<8x32xf32, #tpu.memory_space<vmem>>, vector<8x32xf32>
    tpu.vector_store %arg15[%c0_46, %c0_47], %50 {strides = array<i32>} : memref<8x32xf32, #tpu.memory_space<vmem>>, vector<8x32xf32>,
    %c1_i32_48 = arith.constant 1 : i32
    %52 = arith.cmpi eq, %arg0, %c1_i32_48 : i32
    %53 = arith.extui %52 : i1 to i32
    %c0_i32_49 = arith.constant 0 : i32
    %54 = arith.cmpi ne, %53, %c0_i32_49 : i32
    scf.if %54 {
      %c0_50 = arith.constant 0 : index
      %c0_51 = arith.constant 0 : index
      %55 = vector.load %arg12[%c0_50, %c0_51] : memref<32x128xf32, #tpu.memory_space<vmem>>, vector<32x128xf32>
      %cst_52 = arith.constant dense<0.000000e+00> : vector<8x128xf32>
      %56 = tpu.matmul %50, %55, %cst_52 {dimension_numbers = #tpu.dot_dimension_numbers<[1], [0], [0], [1], [0, 0, 1, 1], [], []>} : vector<8x32xf32>, vector<32x128xf32>, vector<8x128xf32> -> vector<8x128xf32>
      %c0_53 = arith.constant 0 : index
      %c0_54 = arith.constant 0 : index
      %57 = vector.load %arg13[%c0_53, %c0_54] : memref<1x128xf32, #tpu.memory_space<vmem>>, vector<1x128xf32>
      %58 = vector.broadcast %57 : vector<1x128xf32> to vector<8x128xf32>
      %59 = arith.addf %56, %58 : vector<8x128xf32>
      %c0_55 = arith.constant 0 : index
      %c0_56 = arith.constant 0 : index
      %60 = vector.load %arg14[%c0_55, %c0_56] : memref<8x128xf32, #tpu.memory_space<vmem>>, vector<8x128xf32>
      tpu.vector_store %arg14[%c0_55, %c0_56], %59 {strides = array<i32>} : memref<8x128xf32, #tpu.memory_space<vmem>>, vector<8x128xf32>,
    } else {
    }
    return
  }
  func.func @transform_0(%arg0: i32, %arg1: memref<16xi32, #tpu.memory_space<smem>>, %arg2: memref<16xi32, #tpu.memory_space<smem>>) -> (i32, i32) {
    %c0_i32 = arith.constant 0 : i32
    %c0_i32_0 = arith.constant 0 : i32
    %c0_i32_1 = arith.constant 0 : i32
    return %c0_i32, %c0_i32_0 : i32, i32
  }
  func.func @transform_1(%arg0: i32, %arg1: memref<16xi32, #tpu.memory_space<smem>>, %arg2: memref<16xi32, #tpu.memory_space<smem>>) -> (i32, i32) {
    %c0_i32 = arith.constant 0 : i32
    %c0_i32_0 = arith.constant 0 : i32
    %c0_i32_1 = arith.constant 0 : i32
    return %c0_i32, %c0_i32_0 : i32, i32
  }
  func.func @transform_2(%arg0: i32, %arg1: memref<16xi32, #tpu.memory_space<smem>>, %arg2: memref<16xi32, #tpu.memory_space<smem>>) -> (i32, i32) {
    %c0_i32 = arith.constant 0 : i32
    %c0_i32_0 = arith.constant 0 : i32
    %c0_i32_1 = arith.constant 0 : i32
    return %c0_i32, %c0_i32_0 : i32, i32
  }
  func.func @transform_3(%arg0: i32, %arg1: memref<16xi32, #tpu.memory_space<smem>>, %arg2: memref<16xi32, #tpu.memory_space<smem>>) -> (i32, i32) {
    %c0_i32 = arith.constant 0 : i32
    %c0_i32_0 = arith.constant 0 : i32
    %c0_i32_1 = arith.constant 0 : i32
    return %c0_i32, %c0_i32_0 : i32, i32
  }
  func.func @transform_4(%arg0: i32, %arg1: memref<16xi32, #tpu.memory_space<smem>>, %arg2: memref<16xi32, #tpu.memory_space<smem>>) -> (i32, i32, i32) {
    %c0_i32 = arith.constant 0 : i32
    %c0_i32_0 = arith.constant 0 : i32
    %c0_i32_1 = arith.constant 0 : i32
    return %arg0, %c0_i32, %c0_i32_0 : i32, i32, i32
  }
  func.func @transform_5(%arg0: i32, %arg1: memref<16xi32, #tpu.memory_space<smem>>, %arg2: memref<16xi32, #tpu.memory_space<smem>>) -> (i32, i32, i32) {
    %c0_i32 = arith.constant 0 : i32
    %c0_i32_0 = arith.constant 0 : i32
    %c0_i32_1 = arith.constant 0 : i32
    return %arg0, %c0_i32, %c0_i32_0 : i32, i32, i32
  }
  func.func @transform_6(%arg0: i32, %arg1: memref<16xi32, #tpu.memory_space<smem>>, %arg2: memref<16xi32, #tpu.memory_space<smem>>) -> (i32, i32, i32) {
    %c0_i32 = arith.constant 0 : i32
    %c0_i32_0 = arith.constant 0 : i32
    %c0_i32_1 = arith.constant 0 : i32
    return %arg0, %c0_i32, %c0_i32_0 : i32, i32, i32
  }
  func.func @transform_7(%arg0: i32, %arg1: memref<16xi32, #tpu.memory_space<smem>>, %arg2: memref<16xi32, #tpu.memory_space<smem>>) -> (i32, i32, i32) {
    %c0_i32 = arith.constant 0 : i32
    %c0_i32_0 = arith.constant 0 : i32
    %c0_i32_1 = arith.constant 0 : i32
    return %arg0, %c0_i32, %c0_i32_0 : i32, i32, i32
  }
  func.func @transform_8(%arg0: i32, %arg1: memref<16xi32, #tpu.memory_space<smem>>, %arg2: memref<16xi32, #tpu.memory_space<smem>>) -> (i32, i32, i32) {
    %c0_i32 = arith.constant 0 : i32
    %c0_i32_0 = arith.constant 0 : i32
    %c0_i32_1 = arith.constant 0 : i32
    return %arg0, %c0_i32, %c0_i32_0 : i32, i32, i32
  }
  func.func @transform_9(%arg0: i32, %arg1: memref<16xi32, #tpu.memory_space<smem>>, %arg2: memref<16xi32, #tpu.memory_space<smem>>) -> (i32, i32) {
    %c0_i32 = arith.constant 0 : i32
    %c0_i32_0 = arith.constant 0 : i32
    %c0_i32_1 = arith.constant 0 : i32
    return %c0_i32, %c0_i32_0 : i32, i32
  }
  func.func @transform_10(%arg0: i32, %arg1: memref<16xi32, #tpu.memory_space<smem>>, %arg2: memref<16xi32, #tpu.memory_space<smem>>) -> (i32, i32) {
    %c0_i32 = arith.constant 0 : i32
    %c0_i32_0 = arith.constant 0 : i32
    %c0_i32_1 = arith.constant 0 : i32
    return %c0_i32, %c0_i32_0 : i32, i32
  }
  func.func @transform_11(%arg0: i32, %arg1: memref<16xi32, #tpu.memory_space<smem>>, %arg2: memref<16xi32, #tpu.memory_space<smem>>) -> (i32, i32) {
    %c0_i32 = arith.constant 0 : i32
    %c0_i32_0 = arith.constant 0 : i32
    %c0_i32_1 = arith.constant 0 : i32
    return %c0_i32, %c0_i32_0 : i32, i32
  }
}

</mosaic_0001>

<bundles_post_ra>
// kernel: tpu_custom_call.1
= control target key start
LH: loop header
LB: loop body
LE: loop exit
PB: predicated region body
PF: predicated region fallthrough
CT: control target
= control target key end

     0   :  { %s3083_s0 = inlined_call_operand.hbm [shape: s32[16], index: 0, kind: input, shape index: {}]   ;;  %s3084_s2 = inlined_call_operand.hbm [shape: f32[8,16], index: 2, kind: input, shape index: {}]   ;;  %s3085_s3 = inlined_call_operand.hbm [shape: f32[16,32], index: 3, kind: input, shape index: {}]   ;;  %s3086_s4 = inlined_call_operand.vmem [shape: f32[1,32], index: 4, kind: input, shape index: {}]   ;;  %s3087_s5 = inlined_call_operand.hbm [shape: f32[32,32], index: 5, kind: input, shape index: {}]   ;;  %s3088_s6 = inlined_call_operand.hbm [shape: f32[2,32,32], index: 6, kind: input, shape index: {}]   ;;  %s3089_s7 = inlined_call_operand.hbm [shape: f32[2,32,32], index: 7, kind: input, shape index: {}]   ;;  %s3090_s8 = inlined_call_operand.hbm [shape: f32[2,32,32], index: 8, kind: input, shape index: {}]   ;;  %s3091_s9 = inlined_call_operand.vmem [shape: f32[2,1,32], index: 9, kind: input, shape index: {}]   ;;  %s3092_s10 = inlined_call_operand.vmem [shape: f32[2,1,32], index: 10, kind: input, shape index: {}]   ;;  %s3093_s11 = inlined_call_operand.vmem [shape: f32[32,128], index: 11, kind: input, shape index: {}]   ;;  %s3094_s12 = inlined_call_operand.vmem [shape: f32[1,128], index: 12, kind: input, shape index: {}]   ;;  %s3095_s13 = inlined_call_operand.hbm [shape: f32[8,128], index: 13, kind: output, shape index: {}]   ;;  %s3096_s1 = inlined_call_operand.vmem [shape: s32[16], index: 1, kind: input, shape index: {}]  }
   0x1   :  { %3117 = sst [smem:[#allocation35_spill]] %s3084_s2  ;;  %s2056_s27 = scalar_lea.hbm %s3083_s0, 16 }
   0x2   :  { %3118 = sst [smem:[#allocation36_spill]] %s3085_s3  ;;  %p2057_p0 = scmp.ne.s32.totalorder %s3083_s0, %s2056_s27 }
   0x3   :  { %3119 = sst [smem:[#allocation37_spill]] %s3086_s4  ;;  %p2060_p1 = scmp.lt.u32.totalorder %s2056_s27, %s3083_s0 }
   0x4   :  { %3120 = sst [smem:[#allocation38_spill]] %s3087_s5 }
   0x5   :  { %3121 = sst [smem:[#allocation39_spill]] %s3088_s6  ;;  %p2062_p2 = pnand %p2060_p1, %p2057_p0 }
   0x6   :  { %3122 = sst [smem:[#allocation40_spill]] %s3091_s9 }
   0x7   :  { %3123 = sst [smem:[#allocation41_spill]] %s3092_s10 }
   0x8   :  { %3124 = sst [smem:[#allocation42_spill]] %s3093_s11 }
   0x9   :  { %3125 = sst [smem:[#allocation43_spill]] %s3094_s12 }
   0xa   :  { %3126 = sst [smem:[#allocation44_spill]] %s3095_s13 }
   0xb   :  { %2065 = shalt.err (!%p2062_p2)  }
   0xc   :  { %s2348_s15 = smov [#allocation13]   ;;  %s20_s20 = sshll.u32 %s3096_s1, 4  ;;  %s21_s20 = int_to_ptr.vmem [resolvable:$true] %s20_s20 }
   0xd   :  { %19 = dma.hbm_to_smem %s3083_s0, 16, %s2348_s15, [#allocation12] }
   0xe   :  { %s2066_s21 = scalar_lea.vmem %s21_s20, 16  ;;  %p2071_p4 = scmp.lt.s32.totalorder %s21_s20, %s21_s20 }
   0xf   :  { %p2067_p3 = scmp.ne.s32.totalorder %s21_s20, %s2066_s21  ;;  %p2072_p5 = scmp.lt.s32.totalorder %s2066_s21, %s2066_s21 }
  0x11   :  { %p2073_p6 = por %p2072_p5, %p2071_p4 }
  0x13   :  { %p2074_p7 = pnand %p2073_p6, %p2067_p3 }
  0x15   :  { %2077 = shalt.err (!%p2074_p7)  }
  0x16   :  { %s2349_s22 = smov [#allocation14]  }
  0x17   :  { %23 = dma.vmem_to_smem %s21_s20, 16, %s2349_s22, [#allocation12] }
  0x18   :  { %2302 = dma.done.wait [#allocation12], 32 }
  0x19   :  { %2303 = vsyncadd [#allocation12], 4294967264 }
  0x1a   :  { %25 = sfence }
  0x1b   :  { %26 = vsyncpa [#allocation16], 0 }
  0x1c   :  { %27 = vsyncpa [#allocation19], 0 }
  0x1d   :  { %28 = vsyncpa [#allocation22], 0 }
  0x1e   :  { %30 = vsyncpa [#allocation22 + $0x1], 0 }
  0x1f   :  { %31 = vsyncpa [#allocation25], 0 }
  0x20   :  { %33 = vsyncpa [#allocation25 + $0x1], 0 }
  0x21   :  { %34 = vsyncpa [#allocation17], 0  ;;  %s2459_s0 = smov 0   ;;  %s2461_s1 = smov 0  }
  0x22   :  { %s2463_s23 = smov 0   ;;  %s2465_s24 = smov 0  }
  0x23 LB: > { %s2478_s25 = sadd.s32 4294967295, %s2338_s24   ;;  %s2481_s26 = sadd.s32 1, %s2338_s24   ;;  %s2338_s24 = sphi %s2465_s24, %s3167_s24   ;;  %s2334_s23 = sphi %s2463_s23, %s3171_s23   ;;  %s2330_s1 = sphi %s2461_s1, %s3170_s1   ;;  %s2326_s0 = sphi %s2459_s0, %s3169_s0  }
  0x24   : > { %3127 = sst [smem:[#allocation33_spill]] %s2481_s26  ;;  %s128_s27 = ssub.s32 %s2338_s24, %s2481_s26 }
  0x25   : > { %s131_s28 = sadd.s32 1, %s2334_s23  ;;  %p129_p8 = scmp.eq.s32.totalorder %s128_s27, 0 }
  0x26   : > { %p138_p9 = scmp.ne.s32.totalorder %s2334_s23, %s2330_s1  ;;  %p139_p10 = scmp.eq.s32.totalorder %s2338_s24, 0 }
  0x27   : > { %p144_p11 = scmp.ne.s32.totalorder %s2330_s1, %s2326_s0  ;;  %p3097_p13 = scmp.eq.s32.totalorder %s2478_s25, 0 }
  0x28   : > { %s2491_s29 = scalar_select %p129_p8, %s2334_s23, %s131_s28  }
  0x29   : > { %p2493_p12 = por %p139_p10, %p138_p9  ;;  %p1736_p0 = scmp.ge.s32.totalorder %s2338_s24, 1 }
  0x2a   : > { %3128 = sst [smem:[#allocation34_spill]] %s2491_s29  ;;  %p322_p1 = scmp.lt.s32.totalorder %s2338_s24, 3 }
  0x2b   : > { %s3129_s30 = scalar_select %p2493_p12, 1, 0 }
  0x2c   : > { %p2502_p2 = por %p3097_p13, %p144_p11  ;;  %p2507_p4 = pnand %p1736_p0, %p322_p1 }
  0x2d   : > { %s2350_s16 = smov [#allocation18]   ;;  %s3104_s20 = sand.u32 1, %s2334_s23  }
  0x2e   : > { %s3130_s14 = scalar_select %p2502_p2, 1, 0 }
  0x2f   : > { %s3131_s15 = scalar_select %p2507_p4, 1, 0 }
  0x30   : > { %s345_s17 = sshll.u32 %s2350_s16, 4  ;;  %p1948_p5 = pneg %p2507_p4  ;;  %s346_s17 = int_to_ptr.vmem [resolvable:$true] %s345_s17 }
  0x31   : > { %s3133_s3 = sld [smem:[#allocation36_spill]] }
  0x32   : > { %p2515_p6 = pnand %p1948_p5, %p3097_p13 }
  0x34   : > { %s3132_s18 = scalar_select %p2515_p6, 1, 0 }
  0x35   : > { %p2530_p9 = pneg %p2515_p6 }
  0x37   : > { %s2078_s0 = scalar_lea.hbm %s3133_s3, 256 }
  0x38   : > { %p2079_p8 = scmp.ne.s32.totalorder %s3133_s3, %s2078_s0  ;;  %p2085_p0 = scmp.lt.u32.totalorder %s2078_s0, %s3133_s3 }
  0x39   : > { %s3134_s16 = scalar_select %p2530_p9, 1, 0 }
  0x3a   : > { %p2081_p10 = pnand %p2530_p9, %p2079_p8 }
  0x3c   : > { %p2082_p11 = pneg %p2081_p10 }
  0x3e   : > { %p2087_p1 = pnand %p2085_p0, %p2082_p11 }
  0x40   : > { %2090 = shalt.err (!%p2087_p1)
}
  0x41   : > { %s2091_s21 = scalar_lea.vmem %s346_s17, 256  ;;  %p2099_p7 = scmp.lt.s32.totalorder %s346_s17, %s346_s17 }
  0x42   : > { %p2092_p5 = scmp.ne.s32.totalorder %s346_s17, %s2091_s21  ;;  %p2100_p2 = scmp.lt.s32.totalorder %s2091_s21, %s2091_s21 }
  0x44   : > { %p2094_p3 = pnand %p2092_p5, %p2530_p9  ;;  %p2101_p4 = por %p2100_p2, %p2099_p7 }
  0x46   : > { %p2095_p13 = pneg %p2094_p3 }
  0x48   : > { %p2102_p12 = pnand %p2101_p4, %p2095_p13 }
  0x4a   : > { %2105 = shalt.err (!%p2102_p12)
}
  0x4b   : > { %s3105_s22 = smov 128   ;;  %s3107_s29 = smov 8  }
  0x4c   : > { %1954 = dma.hbm_to_vmem [thread:$0]  (!%p2515_p6), %s3133_s3, 256, %s346_s17, [#allocation19], %s3105_s22, %s3105_s22, %s3107_s29  }
  0x4d   : > { %s2551_s27 = sshll.u32 %s3104_s20, 5  ;;  %s2554_s28 = sshll.u32 %s2338_s24, 9 }
  0x4e   : > { %s3135_s6 = sld [smem:[#allocation39_spill]]  ;;  %s385_s12 = scalar_lea.vmem [#allocation21], %s2551_s27 }
  0x4f   : > { %s392_s11 = sshll.u32 %s385_s12, 4  ;;  %p3136_p12 = scmp.ne.s32.totalorder %s3129_s30, 0  ;;  %s2571_s11 = int_to_ptr.vmem [resolvable:$true] %s392_s11 }
  0x50   : > { %p3137_p13 = scmp.lt.s32.totalorder %s2338_s24, 2  ;;  %s2353_s19 = smov [#allocation15]  }
  0x51   : > { %s2573_s0 = sshll.u32 %s2353_s19, 4  ;;  %s3139_s26 = sand.u32 1, %s2338_s24   ;;  %s336_s0 = int_to_ptr.vmem [resolvable:$true] %s2573_s0 }
  0x52   : > { %p2567_p2 = pnand %p3137_p13, %p3136_p12  ;;  %s2577_s21 = scalar_lea.sflag [#allocation22], %s3139_s26 }
  0x54   : > { %s2560_s13 = scalar_lea.hbm %s3135_s6, %s2554_s28  ;;  %p2583_p4 = pneg %p2567_p2 }
  0x55   : > { %s3138_s17 = scalar_select %p2567_p2, 1, 0 }
  0x56   : > { %s2106_s20 = scalar_lea.hbm %s2560_s13, 512  ;;  %s2111_s29 = scalar_lea.hbm %s3135_s6, 1024 }
  0x57   : > { %p2107_p3 = scmp.ne.s32.totalorder %s2560_s13, %s2106_s20  ;;  %p2112_p10 = scmp.lt.u32.totalorder %s2560_s13, %s3135_s6 }
  0x58   : > { %s3140_s12 = scalar_select %p2583_p4, 1, 0 }
  0x59   : > { %p2109_p7 = pnand %p2583_p4, %p2107_p3  ;;  %p2113_p11 = scmp.lt.u32.totalorder %s2111_s29, %s2106_s20 }
  0x5a   : > { %p2115_p1 = scmp.lt.u32.totalorder %s2106_s20, %s2560_s13 }
  0x5b   : > { %p2110_p8 = pneg %p2109_p7  ;;  %p2114_p0 = por %p2113_p11, %p2112_p10 }
  0x5d   : > { %p2116_p5 = por %p2115_p1, %p2114_p0 }
  0x5f   : > { %p2117_p12 = pnand %p2116_p5, %p2110_p8 }
  0x61   : > { %2120 = shalt.err (!%p2117_p12)
}
  0x62   : > { %s2121_s24 = scalar_lea.vmem %s2571_s11, 512  ;;  %s2354_s22 = smov [#allocation21]  }
  0x63   : > { %p2122_p13 = scmp.ne.s32.totalorder %s2571_s11, %s2121_s24  ;;  %s2126_s26 = sshll.u32 %s2354_s22, 4  ;;  %s2127_s26 = int_to_ptr.vmem [resolvable:$false] %s2126_s26 }
  0x64   : > { %s2128_s3 = scalar_lea.vmem %s2127_s26, 1024  ;;  %p2129_p6 = scmp.lt.s32.totalorder %s2571_s11, %s2127_s26 }
  0x65   : > { %p2124_p3 = pnand %p2122_p13, %p2583_p4  ;;  %p2130_p9 = scmp.lt.s32.totalorder %s2128_s3, %s2121_s24 }
  0x67   : > { %p2125_p7 = pneg %p2124_p3  ;;  %p2131_p10 = por %p2130_p9, %p2129_p6 }
  0x69   : > { %p2132_p11 = pnand %p2131_p10, %p2125_p7 }
  0x6b   : > { %2135 = shalt.err (!%p2132_p11)
}
  0x6c   : > { %s3141_s20 = smov 8   ;;  %s3142_s29 = smov 128  }
  0x6d   : > { %1961 = dma.hbm_to_vmem [thread:$0]  (!%p2567_p2), %s2560_s13, 512, %s2571_s11, %s2577_s21, %s3142_s29, %s3142_s29, %s3141_s20  }
  0x6e   : > { %s3143_s2 = sld [smem:[#allocation35_spill]]  ;;  %p3144_p9 = scmp.ne.s32.totalorder %s3134_s16, 0 }
  0x74   : > { %s2136_s22 = scalar_lea.hbm %s3143_s2, 128 }
  0x75   : > { %p2137_p6 = scmp.ne.s32.totalorder %s3143_s2, %s2136_s22  ;;  %p2143_p1 = scmp.lt.u32.totalorder %s2136_s22, %s3143_s2 }
  0x77   : > { %p2139_p8 = pnand %p2137_p6, %p3144_p9 }
  0x79   : > { %p2140_p0 = pneg %p2139_p8 }
  0x7b   : > { %p2145_p5 = pnand %p2143_p1, %p2140_p0 }
  0x7d   : > { %2148 = shalt.err (!%p2145_p5)
}
  0x7e   : > { %s2149_s4 = scalar_lea.vmem %s336_s0, 128  ;;  %p2157_p7 = scmp.lt.s32.totalorder %s336_s0, %s336_s0 }
  0x7f   : > { %p2150_p12 = scmp.ne.s32.totalorder %s336_s0, %s2149_s4  ;;  %p2158_p10 = scmp.lt.s32.totalorder %s2149_s4, %s2149_s4 }
  0x81   : > { %p2152_p13 = pnand %p2150_p12, %p3144_p9  ;;  %p2159_p11 = por %p2158_p10, %p2157_p7 }
  0x83   : > { %p2153_p3 = pneg %p2152_p13 }
  0x85   : > { %p2160_p2 = pnand %p2159_p11, %p2153_p3 }
  0x87   : > { %2163 = shalt.err (!%p2160_p2)
}
  0x88   : > { %p3145_p6 = scmp.ne.s32.totalorder %s3132_s18, 0  ;;  %s2355_s6 = smov [#allocation20]  }
  0x89   : > { %s361_s30 = sshll.u32 %s2355_s6, 4  ;;  %s2633_s24 = scalar_lea.hbm %s3089_s7, %s2554_s28  ;;  %s362_s30 = int_to_ptr.vmem [resolvable:$true] %s361_s30 }
  0x8a   : > { %1951 = dma.hbm_to_vmem [thread:$0]  (!%p3145_p6), %s3143_s2, 128, %s336_s0, [#allocation16]  }
  0x8b   : > { %s3146_s5 = sld [smem:[#allocation38_spill]] }
  0x91   : > { %s2164_s3 = scalar_lea.hbm %s3146_s5, 512 }
  0x92   : > { %p2165_p2 = scmp.ne.s32.totalorder %s3146_s5, %s2164_s3  ;;  %p2171_p1 = scmp.lt.u32.totalorder %s2164_s3, %s3146_s5 }
  0x94   : > { %p2167_p8 = pnand %p2165_p2, %p3144_p9 }
  0x96   : > { %p2168_p0 = pneg %p2167_p8 }
  0x98   : > { %p2173_p5 = pnand %p2171_p1, %p2168_p0 }
  0x9a   : > { %2176 = shalt.err (!%p2173_p5)
}
  0x9b   : > { %s2177_s13 = scalar_lea.vmem %s362_s30, 512  ;;  %p2185_p7 = scmp.lt.s32.totalorder %s362_s30, %s362_s30 }
  0x9c   : > { %p2178_p12 = scmp.ne.s32.totalorder %s362_s30, %s2177_s13  ;;  %p2186_p10 = scmp.lt.s32.totalorder %s2177_s13, %s2177_s13 }
  0x9e   : > { %p2180_p13 = pnand %p2178_p12, %p3144_p9  ;;  %p2187_p11 = por %p2186_p10, %p2185_p7 }
  0xa0   : > { %p2181_p3 = pneg %p2180_p13 }
  0xa2   : > { %p2188_p4 = pnand %p2187_p11, %p2181_p3 }
  0xa4   : > { %2191 = shalt.err (!%p2188_p4)
}
  0xa5   : > { %1957 = dma.hbm_to_vmem [thread:$0]  (!%p3145_p6), %s3146_s5, 512, %s362_s30, [#allocation19], %s3142_s29, %s3142_s29, %s3141_s20  }
  0xa6   : > { %s406_s16 = scalar_lea.vmem [#allocation23], %s2551_s27  ;;  %s2192_s19 = scalar_lea.hbm %s2633_s24, 512 }
  0xa7   : > { %s413_s6 = sshll.u32 %s406_s16, 4  ;;  %p2193_p4 = scmp.ne.s32.totalorder %s2633_s24, %s2192_s19  ;;  %s2657_s6 = int_to_ptr.vmem [resolvable:$true] %s413_s6 }
  0xa8   : > { %p3147_p9 = scmp.ne.s32.totalorder %s3140_s12, 0  ;;  %s2197_s4 = scalar_lea.hbm %s3089_s7, 1024 }
  0xa9   : > { %p2198_p0 = scmp.lt.u32.totalorder %s2633_s24, %s3089_s7  ;;  %p2199_p1 = scmp.lt.u32.totalorder %s2197_s4, %s2192_s19 }
  0xaa   : > { %p2195_p2 = pnand %p2193_p4, %p3147_p9  ;;  %p2201_p6 = scmp.lt.u32.totalorder %s2192_s19, %s2633_s24 }
  0xab   : > { %p2200_p5 = por %p2199_p1, %p2198_p0 }
  0xac   : > { %p2196_p8 = pneg %p2195_p2 }
  0xad   : > { %p2202_p12 = por %p2201_p6, %p2200_p5 }
  0xaf   : > { %p2203_p13 = pnand %p2202_p12, %p2196_p8 }
  0xb1   : > { %2206 = shalt.err (!%p2203_p13)
}
  0xb2   : > { %s2207_s30 = scalar_lea.vmem %s2657_s6, 512  ;;  %s2356_s0 = smov [#allocation23]  }
  0xb3   : > { %p2208_p3 = scmp.ne.s32.totalorder %s2657_s6, %s2207_s30  ;;  %s2212_s11 = sshll.u32 %s2356_s0, 4  ;;  %s2213_s11 = int_to_ptr.vmem [resolvable:$false] %s2212_s11 }
  0xb4   : > { %s2214_s13 = scalar_lea.vmem %s2213_s11, 1024  ;;  %p2215_p11 = scmp.lt.s32.totalorder %s2657_s6, %s2213_s11 }
  0xb5   : > { %p2210_p7 = pnand %p2208_p3, %p3147_p9  ;;  %p2216_p4 = scmp.lt.s32.totalorder %s2214_s13, %s2207_s30 }
  0xb7   : > { %p2211_p10 = pneg %p2210_p7  ;;  %p2217_p2 = por %p2216_p4, %p2215_p11 }
  0xb9   : > { %p2218_p0 = pnand %p2217_p2, %p2211_p10 }
  0xbb   : > { %2221 = shalt.err (!%p2218_p0)
}
  0xbc   : > { %p3148_p8 = scmp.ne.s32.totalorder %s3138_s17, 0  ;;  %s2688_s16 = scalar_lea.hbm %s3090_s8, %s2554_s28 }
  0xbd   : > { %s427_s19 = scalar_lea.vmem [#allocation24], %s2551_s27  ;;  %s3149_s22 = sand.u32 1, %s2334_s23  }
  0xbe   : > { %1964 = dma.hbm_to_vmem [thread:$0]  (!%p3148_p8), %s2633_s24, 512, %s2657_s6, %s2577_s21, %s3142_s29, %s3142_s29, %s3141_s20  }
  0xbf   : > { %s434_s18 = sshll.u32 %s427_s19, 4  ;;  %s2695_s4 = scalar_lea.sflag [#allocation25], %s3149_s22  ;;  %s2691_s18 = int_to_ptr.vmem [resolvable:$true] %s434_s18 }
  0xc0   : > { %s2222_s26 = scalar_lea.hbm %s2688_s16, 512  ;;  %s2227_s28 = scalar_lea.hbm %s3090_s8, 1024 }
  0xc1   : > { %p2223_p1 = scmp.ne.s32.totalorder %s2688_s16, %s2222_s26  ;;  %p2228_p12 = scmp.lt.u32.totalorder %s2688_s16, %s3090_s8 }
  0xc2   : > { %p2229_p13 = scmp.lt.u32.totalorder %s2227_s28, %s2222_s26  ;;  %p2231_p7 = scmp.lt.u32.totalorder %s2222_s26, %s2688_s16 }
  0xc3   : > { %p2225_p5 = pnand %p2223_p1, %p3147_p9 }
  0xc4   : > { %p2230_p3 = por %p2229_p13, %p2228_p12 }
  0xc5   : > { %p2226_p6 = pneg %p2225_p5 }
  0xc6   : > { %p2232_p10 = por %p2231_p7, %p2230_p3 }
  0xc8   : > { %p2233_p11 = pnand %p2232_p10, %p2226_p6 }
  0xca   : > { %2236 = shalt.err (!%p2233_p11)
}
  0xcb   : > { %s2237_s27 = scalar_lea.vmem %s2691_s18, 512  ;;  %s2357_s30 = smov [#allocation24]  }
  0xcc   : > { %p2238_p4 = scmp.ne.s32.totalorder %s2691_s18, %s2237_s27  ;;  %s2242_s0 = sshll.u32 %s2357_s30, 4  ;;  %s2243_s0 = int_to_ptr.vmem [resolvable:$false] %s2242_s0 }
  0xcd   : > { %s2244_s11 = scalar_lea.vmem %s2243_s0, 1024  ;;  %p2245_p1 = scmp.lt.s32.totalorder %s2691_s18, %s2243_s0 }
  0xce   : > { %p2240_p2 = pnand %p2238_p4, %p3147_p9  ;;  %p2246_p5 = scmp.lt.s32.totalorder %s2244_s11, %s2237_s27 }
  0xd0   : > { %p2241_p0 = pneg %p2240_p2  ;;  %p2247_p12 = por %p2246_p5, %p2245_p1 }
  0xd2   : > { %p2248_p13 = pnand %p2247_p12, %p2241_p0 }
  0xd4   : > { %2251 = shalt.err (!%p2248_p13)
}
  0xd5   : > { %1967 = dma.hbm_to_vmem [thread:$0]  (!%p3148_p8), %s2688_s16, 512, %s2691_s18, %s2695_s4, %s3142_s29, %s3142_s29, %s3141_s20  }
  0xd6   : > { %p3150_p9 = scmp.ne.s32.totalorder %s3131_s15, 0 }
  0xd7   : > { %p3151_p6 = scmp.eq.s32.totalorder (!%p3150_p9), %s2478_s25, 0 }
  0xd8   : > { %458 = sbr.rel (%p3150_p9) target bundleno = 1938 (0x792), region = 64 }
  0xdf   : > { %2305 = dma.done.wait (%p3151_p6), [#allocation16], 128   ;;  %p3152_p3 = pmov %p3151_p6 }
  0xe1   : > { %2307 = vsyncadd (%p3152_p3), [#allocation16], 4294967168  ;;  %p3153_p7 = pmov %p3152_p3 }
  0xe2   : > { %p3154_p10 = pmov %p3152_p3 }
  0xe3   : > { %2309 = dma.done.wait (%p3153_p7), [#allocation19], 768  }
  0xe4   : > { %2311 = vsyncadd (%p3154_p10), [#allocation19], 4294966528  ;;  %s472_s17 = sand.u32 1, %s2478_s25   ;;  %s474_s12 = sand.u32 1, %s2330_s1  }
  0xe5   : > { %s1754_s20 = sshll.u32 %s474_s12, 5  ;;  %s473_s15 = scalar_lea.sflag [#allocation22], %s472_s17 }
  0xe6   : > { %s2734_s29 = scalar_lea.vmem [#allocation21], %s1754_s20  ;;  %p3155_p8 = scmp.ne.s32.totalorder %s3130_s14, 0 }
  0xe8   : > { %2313 = dma.done.wait (%p3155_p8), %s473_s15, 1024  }
  0xe9   : > { %2315 = vsyncadd (%p3155_p8), %s473_s15, 4294966272  ;;  %s2740_s13 = scalar_lea.vmem [#allocation23], %s1754_s20  ;;  %s491_s9 = scalar_lea.sflag [#allocation25], %s474_s12 }
  0xea   : > { %s2742_s10 = scalar_lea.vmem [#allocation24], %s1754_s20 }
  0xeb   : > { %2317 = dma.done.wait (%p3155_p8), %s491_s9, 512  }
  0xec   : > { %2319 = vsyncadd (%p3155_p8), %s491_s9, 4294966784  ;;  %p544_p11 = scmp.lt.s32.totalorder %s2478_s25, 1  ;;  %p3158_p4 = scmp.ne.s32.totalorder %s2478_s25, 0 }
  0xed   : > { %v555_v0 = vld [vmem:[#allocation18] sm:$0xff] (!%p3158_p4)  ;;  %v556_v1 = vld [vmem:[#allocation18 + $0x8] sm:$0xff] (!%p3158_p4)  ;;  %v2358_v2 = vmov (!%p3158_p4), 0.0|0.0   ;;  %vm2359_vm0 = vmmov (!%p3158_p4), 0   ;;  %v2360_v4 = vmov (!%p3158_p4), 0.0   ;;  %v554_v5 = vld [vmem:[#allocation15] sm:$0xff] (!%p3158_p4) }
  0xee   : > { %s2750_s16 = scalar_select %p544_p11, %s2478_s25, 1 }
  0xef   : > { %553 = sbr.rel (%p3158_p4) target bundleno = 459 (0x1cb), region = 92  ;;  %1887 = vmatprep.subr.bf16.mxu0 (!%p3158_p4), %v2358_v2  ;;  %v1888_v3 = vpack.c.bf16 (!%p3158_p4), %v556_v1, %v555_v0  ;;  %1818 = vmatprep.mubr.msk.f32.mxu0 (!%p3158_p4), %vm2359_vm0, %v2360_v4  ;;  %vm564_vm1 = vcmask (!%p3158_p4), 130048   ;;  %s3159_s3 = sld [smem:[#allocation37_spill]] (!%p3158_p4)  ;;  %vm638_vm2 = vcmask (!%p3158_p4), 261120  }
  0xf1   : > { %1889 = vmatpush3.bf16.msra.mxu0 (!%p3158_p4), %v1888_v3 }
  0xf4   : > { %1819 = vmatmul.mubr.msk.f32.vlgmr.msra.gmra.mrb[0].mxu0 (!%p3158_p4), %vm564_vm1, %v554_v5 }
  0xf5   : > { %v1758_v6 = vld [vmem:[%s3159_s3] ss:$0 sm:$0xff] (!%p3158_p4) }
 0x1c7   : > { %v634_v7 = vpop.f32.mrb[0].mxu0 }
 0x1c8   : > { %v635_v8 = vadd.f32 %v1758_v6, %v634_v7  ;;  %v1820_v9 = vpop.f32.mrb[1].mxu0 }
 0x1ca   : > { %639 = vst.msk [vmem:[#allocation2] sm:$0xff] %vm638_vm2, %v635_v8 }
 0x1cb PF: > { %v641_v10 = vld [vmem:[%s2734_s29] sm:$0xff]  ;;  %v642_v11 = vld [vmem:[%s2734_s29 + $0x8] sm:$0xff]  ;;  %v643_v12 = vld [vmem:[%s2734_s29 + $0x10] sm:$0xff]  ;;  %v2361_v13 = vmov 0.0|0.0   ;;  %vm645_vm3 = vcmask 261120   ;;  %vm2362_vm4 = vmmov 0  }
 0x1cc   : > { %1890 = vmatprep.subr.bf16.mxu0 %v2361_v13  ;;  %v1891_v14 = vpack.c.bf16 %v642_v11, %v641_v10  ;;  %v644_v15 = vld [vmem:[%s2734_s29 + $0x18] sm:$0xff]  ;;  %1896 = vmatprep.subr.bf16.mxu1 %v2361_v13  ;;  %v720_v16 = vld [vmem:[%s2740_s13] sm:$0xff]  ;;  %v2363_v17 = vmov 0.0   ;;  %v721_v18 = vld [vmem:[%s2740_s13 + $0x8] sm:$0xff]  ;;  %s2801_s27 = smov 0  }
 0x1cd   : > { %1829 = vmatprep.mubr.msk.f32.mxu0 %vm2362_vm4, %v2363_v17  ;;  %870 = vst.msk [vmem:[#allocation6] sm:$0xff] %vm645_vm3, %v2363_v17  ;;  %871 = vst.msk [vmem:[#allocation7] sm:$0xff] %vm645_vm3, %v2363_v17  ;;  %1840 = vmatprep.mubr.msk.f32.mxu1 %vm2362_vm4, %v2363_v17  ;;  %v1894_v19 = vpack.c.bf16 %v644_v15, %v643_v12  ;;  %v1897_v20 = vpack.c.bf16 %v721_v18, %v720_v16  ;;  %v722_v21 = vld [vmem:[%s2740_s13 + $0x10] sm:$0xff]  ;;  %v723_v22 = vld [vmem:[%s2740_s13 + $0x18] sm:$0xff] }
 0x1ce   : > { %1892 = vmatpush3.bf16.msra.mxu0 %v1891_v14  ;;  %v795_v23 = vld [vmem:[%s2742_s10] sm:$0xff]  ;;  %v796_v24 = vld [vmem:[%s2742_s10 + $0x8] sm:$0xff]  ;;  %v1900_v25 = vpack.c.bf16 %v723_v22, %v722_v21  ;;  %v797_v28 = vld [vmem:[%s2742_s10 + $0x10] sm:$0xff] }
 0x1cf   : > { %1893 = vmatprep.subr.bf16.mxu0 %v2361_v13  ;;  %1898 = vmatpush3.bf16.msra.mxu1 %v1897_v20  ;;  %v1903_v27 = vpack.c.bf16 %v796_v24, %v795_v23  ;;  %v798_v29 = vld [vmem:[%s2742_s10 + $0x18] sm:$0xff]  ;;  %v2790_v31 = vld [vmem:[#allocation20] sm:$0xff]  ;;  %v2792_v32 = vld [vmem:[#allocation20 + $0x8] sm:$0xff] }
 0x1d0   : > { %1899 = vmatprep.subr.bf16.mxu1 %v2361_v13  ;;  %v1906_v30 = vpack.c.bf16 %v798_v29, %v797_v28  ;;  %v2794_v33 = vld [vmem:[#allocation20 + $0x10] sm:$0xff]  ;;  %v2796_v34 = vld [vmem:[#allocation20 + $0x18] sm:$0xff] }
 0x1d1   : > { %v2779_v26 = vld [vmem:[#allocation2] sm:$0xff] }
 0x1d2   : > { %1895 = vmatpush3.bf16.msra.mxu0 %v1894_v19 }
 0x1d3   : > { %1902 = vmatprep.subr.bf16.mxu0 %v2361_v13  ;;  %1901 = vmatpush3.bf16.msra.mxu1 %v1900_v25 }
 0x1d5   : > { %1830 = vmatmul.mubr.msk.f32.vlgmr.msra.gmra.mrb[0].mxu0 %vm645_vm3, %v2779_v26 }
 0x1d6   : > { %1904 = vmatpush3.bf16.msra.mxu0 %v1903_v27  ;;  %1851 = vmatprep.mubr.msk.f32.mxu0 %vm2362_vm4, %v2363_v17 }
 0x1d7   : > { %1905 = vmatprep.subr.bf16.mxu0 %v2361_v13  ;;  %1841 = vmatmul.mubr.msk.f32.vlgmr.msra.gmra.mrb[0].mxu1 %vm645_vm3, %v2779_v26 }
 0x1da   : > { %1907 = vmatpush3.bf16.msra.mxu0 %v1906_v30 }
 0x1dd   : > { %1852 = vmatmul.mubr.msk.f32.vlgmr.msra.gmra.mrb[2].mxu0 %vm645_vm3, %v2779_v26 }
 0x2a8   : > { %v715_v35 = vpop.f32.mrb[0].mxu0 }
 0x2a9   : > { %719 = vst.msk [vmem:[#allocation3] sm:$0xff] %vm645_vm3, %v715_v35  ;;  %v1831_v36 = vpop.f32.mrb[1].mxu0 }
 0x2aa   : > { %v790_v37 = vpop.f32.mrb[0].mxu1 }
 0x2ab   : > { %794 = vst.msk [vmem:[#allocation4] sm:$0xff] %vm645_vm3, %v790_v37  ;;  %v1842_v38 = vpop.f32.mrb[1].mxu1 }
 0x2b0   : > { %v865_v39 = vpop.f32.mrb[2].mxu0 }
 0x2b1   : > { %869 = vst.msk [vmem:[#allocation5] sm:$0xff] %vm645_vm3, %v865_v39  ;;  %v1853_v40 = vpop.f32.mrb[3].mxu0 }
 0x2b2 LB: >> { %v2808_v41 = vpack.c.bf16 %v2792_v32, %v2790_v31  ;;  %v2364_v42 = vmov 0.0|0.0   ;;  %v2813_v43 = vpack.c.bf16 %v2796_v34, %v2794_v33  ;;  %vm2365_vm5 = vmmov 0   ;;  %s2816_s30 = sshll.u32 %s2342_s27, 3  ;;  %s881_s27 = sadd.s32 1, %s2342_s27   ;;  %s2342_s27 = sphi %s2801_s27, %s881_s27  }
 0x2b3   : >> { %1908 = vmatprep.subr.bf16.mxu0 %v2364_v42  ;;  %v2366_v44 = vmov 0.0   ;;  %s883_s0 = sld [smem:[#allocation13 + %s2816_s30]]  ;;  %s2821_s17 = sadd.s32 1, %s2816_s30  ;;  %vm887_vm6 = vcmask 253952   ;;  %v1035_v2 = vlaneseq  ;;  %v1037_v6 = vstv %s2816_s30 }
 0x2b4   : >> { %1910 = vmatpush3.bf16.msra.mxu0 %v2808_v41  ;;  %1862 = vmatprep.mubr.msk.f32.mxu0 %vm2365_vm5, %v2366_v44  ;;  %s884_s11 = sld [smem:[#allocation14 + %s2816_s30]]  ;;  %s2824_s12 = sadd.s32 2, %s2816_s30 }
 0x2b5   : >> { %1911 = vmatprep.subr.bf16.mxu0 %v2364_v42  ;;  %s893_s20 = sld [smem:[#allocation13 + %s2821_s17]]  ;;  %s2832_s9 = sadd.s32 3, %s2816_s30  ;;  %v2874_v5 = vshrl.u32 %v1035_v2, 7 }
 0x2b6   : >> { %s894_s15 = sld [smem:[#allocation14 + %s2821_s17]]  ;;  %s2835_s10 = sadd.s32 4, %s2816_s30 }
 0x2b7   : >> { %s902_s29 = sld [smem:[#allocation13 + %s2824_s12]]  ;;  %v1038_v7 = vadd.s32 %v1037_v6, %v2874_v5  ;;  %p878_p2 = scmp.ge.s32.totalorder %s881_s27, 2  }
 0x2b8   : >> { %1913 = vmatpush3.bf16.msra.mxu0 %v2813_v43  ;;  %s903_s13 = sld [smem:[#allocation14 + %s2824_s12]] }
 0x2b9   : >> { %s911_s19 = sld [smem:[#allocation13 + %s2832_s9]]  ;;  %s885_s22 = scalar_lea.vmem [#allocation3], %s883_s0  ;;  %vm1039_vm7 = vcmp.lt.s32.totalorder %v1038_v7, 16 }
 0x2ba   : >> { %s912_s18 = sld [smem:[#allocation14 + %s2832_s9]]  ;;  %v886_v45 = vld [vmem:[%s885_s22] sm:$0x1]  ;;  %s889_s26 = scalar_lea.vmem [#allocation4], %s884_s11 }
 0x2bb   : >> { %v890_v46 = vld [vmem:[%s889_s26] sm:$0x1]  ;;  %s920_s21 = sld [smem:[#allocation13 + %s2835_s10]]  ;;  %888 = vst.msk [vmem:[#allocation8] sm:$0x1] %vm887_vm6, %v886_v45  ;;  %s895_s14 = scalar_lea.vmem [#allocation3], %s893_s20 }
 0x2bc   : >> { %s921_s24 = sld [smem:[#allocation14 + %s2835_s10]]  ;;  %891 = vst.msk [vmem:[#allocation9] sm:$0x1] %vm887_vm6, %v890_v46  ;;  %v896_v47 = vld [vmem:[%s895_s14] sm:$0x1]  ;;  %s898_s6 = scalar_lea.vmem [#allocation4], %s894_s15 }
 0x2bd   : >> { %v899_v48 = vld [vmem:[%s898_s6] sm:$0x1]  ;;  %897 = vst.msk [vmem:[#allocation8 + $0x1] sm:$0x1] %vm887_vm6, %v896_v47  ;;  %s904_s3 = scalar_lea.vmem [#allocation3], %s902_s29  ;;  %s2846_s11 = sadd.s32 5, %s2816_s30 }
 0x2be   : >> { %900 = vst.msk [vmem:[#allocation9 + $0x1] sm:$0x1] %vm887_vm6, %v899_v48  ;;  %v905_v49 = vld [vmem:[%s904_s3] sm:$0x1]  ;;  %s907_s0 = scalar_lea.vmem [#allocation4], %s903_s13  ;;  %s2849_s22 = sadd.s32 6, %s2816_s30 }
 0x2bf   : >> { %v908_v50 = vld [vmem:[%s907_s0] sm:$0x1]  ;;  %906 = vst.msk [vmem:[#allocation8 + $0x2] sm:$0x1] %vm887_vm6, %v905_v49  ;;  %s913_s20 = scalar_lea.vmem [#allocation3], %s911_s19  ;;  %s929_s29 = sld [smem:[#allocation13 + %s2846_s11]] }
 0x2c0   : >> { %909 = vst.msk [vmem:[#allocation9 + $0x2] sm:$0x1] %vm887_vm6, %v908_v50  ;;  %v914_v51 = vld [vmem:[%s913_s20] sm:$0x1]  ;;  %s916_s15 = scalar_lea.vmem [#allocation4], %s912_s18  ;;  %s930_s13 = sld [smem:[#allocation14 + %s2846_s11]] }
 0x2c1   : >> { %v917_v52 = vld [vmem:[%s916_s15] sm:$0x1]  ;;  %915 = vst.msk [vmem:[#allocation8 + $0x3] sm:$0x1] %vm887_vm6, %v914_v51  ;;  %s922_s26 = scalar_lea.vmem [#allocation3], %s920_s21  ;;  %s938_s6 = sld [smem:[#allocation13 + %s2849_s22]] }
 0x2c2   : >> { %918 = vst.msk [vmem:[#allocation9 + $0x3] sm:$0x1] %vm887_vm6, %v917_v52  ;;  %v923_v53 = vld [vmem:[%s922_s26] sm:$0x1]  ;;  %s925_s14 = scalar_lea.vmem [#allocation4], %s921_s24  ;;  %s939_s3 = sld [smem:[#allocation14 + %s2849_s22]] }
 0x2c3   : >> { %v926_v54 = vld [vmem:[%s925_s14] sm:$0x1]  ;;  %924 = vst.msk [vmem:[#allocation8 + $0x4] sm:$0x1] %vm887_vm6, %v923_v53  ;;  %s2862_s19 = sadd.s32 7, %s2816_s30 }
 0x2c4   : >> { %927 = vst.msk [vmem:[#allocation9 + $0x4] sm:$0x1] %vm887_vm6, %v926_v54  ;;  %s947_s18 = sld [smem:[#allocation13 + %s2862_s19]] }
 0x2c5   : >> { %s948_s0 = sld [smem:[#allocation14 + %s2862_s19]]  ;;  %s931_s20 = scalar_lea.vmem [#allocation3], %s929_s29 }
 0x2c6   : >> { %v932_v55 = vld [vmem:[%s931_s20] sm:$0x1]  ;;  %s934_s15 = scalar_lea.vmem [#allocation4], %s930_s13  ;;  %s1043_s29 = sld [smem:[#allocation13 + %s2816_s30]] }
 0x2c7   : >> { %v935_v56 = vld [vmem:[%s934_s15] sm:$0x1]  ;;  %933 = vst.msk [vmem:[#allocation8 + $0x5] sm:$0x1] %vm887_vm6, %v932_v55  ;;  %s940_s21 = scalar_lea.vmem [#allocation3], %s938_s6  ;;  %s1048_s6 = sld [smem:[#allocation13 + %s2821_s17]] }
 0x2c8   : >> { %936 = vst.msk [vmem:[#allocation9 + $0x5] sm:$0x1] %vm887_vm6, %v935_v56  ;;  %v941_v57 = vld [vmem:[%s940_s21] sm:$0x1]  ;;  %s943_s24 = scalar_lea.vmem [#allocation4], %s939_s3  ;;  %s1056_s3 = sld [smem:[#allocation13 + %s2824_s12]] }
 0x2c9   : >> { %v944_v58 = vld [vmem:[%s943_s24] sm:$0x1]  ;;  %942 = vst.msk [vmem:[#allocation8 + $0x6] sm:$0x1] %vm887_vm6, %v941_v57  ;;  %s1063_s30 = sld [smem:[#allocation13 + %s2832_s9]] }
 0x2ca   : >> { %945 = vst.msk [vmem:[#allocation9 + $0x6] sm:$0x1] %vm887_vm6, %v944_v58  ;;  %s949_s26 = scalar_lea.vmem [#allocation3], %s947_s18  ;;  %s1070_s17 = sld [smem:[#allocation13 + %s2835_s10]] }
 0x2cb   : >> { %v950_v59 = vld [vmem:[%s949_s26] sm:$0x1]  ;;  %s952_s14 = scalar_lea.vmem [#allocation4], %s948_s0  ;;  %s1077_s12 = sld [smem:[#allocation13 + %s2846_s11]] }
 0x2cc   : >> { %v953_v60 = vld [vmem:[%s952_s14] sm:$0x1]  ;;  %951 = vst.msk [vmem:[#allocation8 + $0x7] sm:$0x1] %vm887_vm6, %v950_v59  ;;  %s1044_s13 = scalar_lea.vmem [#allocation6], %s1043_s29  ;;  %s1084_s9 = sld [smem:[#allocation13 + %s2849_s22]] }
 0x2cd   : >> { %954 = vst.msk [vmem:[#allocation9 + $0x7] sm:$0x1] %vm887_vm6, %v953_v60  ;;  %v1045_v8 = vld [vmem:[%s1044_s13] sm:$0x1]  ;;  %s1049_s18 = scalar_lea.vmem [#allocation6], %s1048_s6  ;;  %s1091_s10 = sld [smem:[#allocation13 + %s2862_s19]] }
 0x2ce   : >> { %s1057_s0 = scalar_lea.vmem [#allocation6], %s1056_s3  ;;  %s2896_s22 = smov (%p878_p2), 0  }
 0x2cf   : >> { %s1064_s20 = scalar_lea.vmem [#allocation6], %s1063_s30 }
 0x2d0   : >> { %s1071_s15 = scalar_lea.vmem [#allocation6], %s1070_s17 }
 0x2d1   : >> { %s1078_s21 = scalar_lea.vmem [#allocation6], %s1077_s12 }
 0x2d2   : >> { %s1085_s24 = scalar_lea.vmem [#allocation6], %s1084_s9 }
 0x2d3   : >> { %v955_v61 = vld [vmem:[#allocation8] sm:$0xff]  ;;  %s1092_s11 = scalar_lea.vmem [#allocation6], %s1091_s10 }
 0x2d4   : >> { %v956_v62 = vld [vmem:[#allocation9] sm:$0xff] }
 0x2d5   : >> { %v957_v63 = vmul.f32 %v956_v62, %v955_v61 }
 0x2d7   : >> { %1863 = vmatmul.mubr.msk.f32.vlgmr.msra.gmra.mrb[0].mxu0 %vm645_vm3, %v957_v63 }
 0x3aa   : >> { %v1027_v0 = vpop.f32.mrb[0].mxu0 }
 0x3ab   : >> { %v1765_v1 = vclamps-f32 %v1027_v0, 10.0  ;;  %v1864_v3 = vpop.f32.mrb[1].mxu0 }
 0x3ad   : >> { %v1033_v4 = vmul.f32 1.442695, %v1765_v1 }
 0x3af   : >> { %2048 = vpow2.f32 %v1033_v4 }
 0x3b9   : >> { %v2049_v9 = vpop.eup %2048 }
 0x3ba   : >> { %v1042_v10 = vsel %vm1039_vm7, %v2049_v9, 0.0 }
 0x3bb   : >> { %v1046_v11 = vadd.f32 %v1045_v8, %v1042_v10  ;;  %v1052_v12 = vrot.slane %v1042_v10, 1  ;;  %v1059_v15 = vrot.slane %v1042_v10, 2  ;;  %v1066_v18 = vrot.slane %v1042_v10, 3 }
 0x3bc   : >> { %v1073_v21 = vrot.slane %v1042_v10, 4  ;;  %v1080_v24 = vrot.slane %v1042_v10, 5  ;;  %v1087_v28 = vrot.slane %v1042_v10, 6  ;;  %v1094_v35 = vrot.slane %v1042_v10, 7 }
 0x3bd   : >> { %1047 = vst.msk [vmem:[%s1044_s13] sm:$0x1] %vm887_vm6, %v1046_v11 }
 0x3c4   : >> { %v1050_v13 = vld [vmem:[%s1049_s18] sm:$0x1] }
 0x3c5   : >> { %v1054_v14 = vadd.f32 %v1052_v12, %v1050_v13 }
 0x3c7   : >> { %1055 = vst.msk [vmem:[%s1049_s18] sm:$0x1] %vm887_vm6, %v1054_v14 }
 0x3ce   : >> { %v1058_v16 = vld [vmem:[%s1057_s0] sm:$0x1] }
 0x3cf   : >> { %v1061_v17 = vadd.f32 %v1059_v15, %v1058_v16 }
 0x3d1   : >> { %1062 = vst.msk [vmem:[%s1057_s0] sm:$0x1] %vm887_vm6, %v1061_v17 }
 0x3d8   : >> { %v1065_v19 = vld [vmem:[%s1064_s20] sm:$0x1] }
 0x3d9   : >> { %v1068_v20 = vadd.f32 %v1066_v18, %v1065_v19 }
 0x3db   : >> { %1069 = vst.msk [vmem:[%s1064_s20] sm:$0x1] %vm887_vm6, %v1068_v20 }
 0x3e2   : >> { %v1072_v22 = vld [vmem:[%s1071_s15] sm:$0x1] }
 0x3e3   : >> { %v1075_v23 = vadd.f32 %v1073_v21, %v1072_v22 }
 0x3e5   : >> { %1076 = vst.msk [vmem:[%s1071_s15] sm:$0x1] %vm887_vm6, %v1075_v23 }
 0x3ec   : >> { %v1079_v25 = vld [vmem:[%s1078_s21] sm:$0x1] }
 0x3ed   : >> { %v1082_v27 = vadd.f32 %v1080_v24, %v1079_v25 }
 0x3ef   : >> { %1083 = vst.msk [vmem:[%s1078_s21] sm:$0x1] %vm887_vm6, %v1082_v27 }
 0x3f6   : >> { %v1086_v29 = vld [vmem:[%s1085_s24] sm:$0x1] }
 0x3f7   : >> { %v1089_v30 = vadd.f32 %v1087_v28, %v1086_v29 }
 0x3f9   : >> { %1090 = vst.msk [vmem:[%s1085_s24] sm:$0x1] %vm887_vm6, %v1089_v30 }
 0x3fd   : > { %880 = sbr.rel (!%p878_p2) target bundleno = 690 (0x2b2), region = 230 }
 0x400   : >> { %v1093_v36 = vld [vmem:[%s1092_s11] sm:$0x1] }
 0x401   : >> { %v1096_v37 = vadd.f32 %v1094_v35, %v1093_v36 }
 0x403   : >> { %1097 = vst.msk [vmem:[%s1092_s11] sm:$0x1] %vm887_vm6, %v1096_v37 }
 0x404 LB: >> { %v2367_v38 = vmov 0.0|0.0   ;;  %vm2368_vm8 = vmmov 0   ;;  %v2369_v39 = vmov 0.0   ;;  %s2903_s19 = sshll.u32 %s2346_s22, 3  ;;  %s1103_s22 = sadd.s32 1, %s2346_s22   ;;  %s2346_s22 = sphi %s2896_s22, %s1103_s22  }
 0x405   : >> { %1914 = vmatprep.subr.bf16.mxu0 %v2367_v38  ;;  %1873 = vmatprep.mubr.msk.f32.mxu0 %vm2368_vm8, %v2369_v39  ;;  %s1105_s27 = sld [smem:[#allocation13 + %s2903_s19]]  ;;  %s2908_s14 = sadd.s32 1, %s2903_s19  ;;  %v1259_v16 = vstv %s2903_s19 }
 0x406   : >> { %1916 = vmatpush3.bf16.msra.mxu0 %v2808_v41  ;;  %s1106_s26 = sld [smem:[#allocation14 + %s2903_s19]]  ;;  %s2911_s29 = sadd.s32 2, %s2903_s19  ;;  %v1260_v17 = vadd.s32 %v1259_v16, %v2874_v5 }
 0x407   : >> { %1917 = vmatprep.subr.bf16.mxu0 %v2367_v38  ;;  %s1115_s13 = sld [smem:[#allocation13 + %s2908_s14]]  ;;  %s2919_s30 = sadd.s32 3, %s2903_s19 }
 0x408   : >> { %s1116_s6 = sld [smem:[#allocation14 + %s2908_s14]]  ;;  %s2922_s0 = sadd.s32 4, %s2903_s19  ;;  %vm1261_vm9 = vcmp.lt.s32.totalorder %v1260_v17, 16 }
 0x409   : >> { %s1124_s3 = sld [smem:[#allocation13 + %s2911_s29]]  ;;  %p1100_p0 = scmp.ge.s32.totalorder %s1103_s22, 2  }
 0x40a   : >> { %1919 = vmatpush3.bf16.msra.mxu0 %v2813_v43  ;;  %s1125_s18 = sld [smem:[#allocation14 + %s2911_s29]]  ;;  %p1771_p1 = scmp.ne.s32.totalorder (%p1100_p0), %s2478_s25, 1 }
 0x40b   : >> { %s1133_s17 = sld [smem:[#allocation13 + %s2919_s30]]  ;;  %s1107_s12 = scalar_lea.vmem [#allocation3], %s1105_s27 }
 0x40c   : >> { %s1134_s20 = sld [smem:[#allocation14 + %s2919_s30]]  ;;  %v1108_v31 = vld [vmem:[%s1107_s12] sm:$0x1]  ;;  %s1111_s15 = scalar_lea.vmem [#allocation4], %s1106_s26 }
 0x40d   : >> { %v1112_v32 = vld [vmem:[%s1111_s15] sm:$0x1]  ;;  %s1142_s9 = sld [smem:[#allocation13 + %s2922_s0]]  ;;  %1110 = vst.msk [vmem:[#allocation8] sm:$0x1] %vm887_vm6, %v1108_v31  ;;  %s1117_s10 = scalar_lea.vmem [#allocation3], %s1115_s13 }
 0x40e   : >> { %s1143_s21 = sld [smem:[#allocation14 + %s2922_s0]]  ;;  %1113 = vst.msk [vmem:[#allocation9] sm:$0x1] %vm887_vm6, %v1112_v32  ;;  %v1118_v33 = vld [vmem:[%s1117_s10] sm:$0x1]  ;;  %s1120_s24 = scalar_lea.vmem [#allocation4], %s1116_s6 }
 0x40f   : >> { %v1121_v34 = vld [vmem:[%s1120_s24] sm:$0x1]  ;;  %1119 = vst.msk [vmem:[#allocation8 + $0x1] sm:$0x1] %vm887_vm6, %v1118_v33  ;;  %s1126_s11 = scalar_lea.vmem [#allocation3], %s1124_s3  ;;  %s2933_s26 = sadd.s32 5, %s2903_s19 }
 0x410   : >> { %1122 = vst.msk [vmem:[#allocation9 + $0x1] sm:$0x1] %vm887_vm6, %v1121_v34  ;;  %v1127_v40 = vld [vmem:[%s1126_s11] sm:$0x1]  ;;  %s1129_s27 = scalar_lea.vmem [#allocation4], %s1125_s18  ;;  %s2936_s12 = sadd.s32 6, %s2903_s19 }
 0x411   : >> { %v1130_v42 = vld [vmem:[%s1129_s27] sm:$0x1]  ;;  %1128 = vst.msk [vmem:[#allocation8 + $0x2] sm:$0x1] %vm887_vm6, %v1127_v40  ;;  %s1135_s13 = scalar_lea.vmem [#allocation3], %s1133_s17  ;;  %s1151_s3 = sld [smem:[#allocation13 + %s2933_s26]] }
 0x412   : >> { %1131 = vst.msk [vmem:[#allocation9 + $0x2] sm:$0x1] %vm887_vm6, %v1130_v42  ;;  %v1136_v44 = vld [vmem:[%s1135_s13] sm:$0x1]  ;;  %s1138_s6 = scalar_lea.vmem [#allocation4], %s1134_s20  ;;  %s1152_s18 = sld [smem:[#allocation14 + %s2933_s26]] }
 0x413   : >> { %v1139_v45 = vld [vmem:[%s1138_s6] sm:$0x1]  ;;  %1137 = vst.msk [vmem:[#allocation8 + $0x3] sm:$0x1] %vm887_vm6, %v1136_v44  ;;  %s1144_s15 = scalar_lea.vmem [#allocation3], %s1142_s9  ;;  %s1160_s17 = sld [smem:[#allocation13 + %s2936_s12]] }
 0x414   : >> { %1140 = vst.msk [vmem:[#allocation9 + $0x3] sm:$0x1] %vm887_vm6, %v1139_v45  ;;  %v1145_v46 = vld [vmem:[%s1144_s15] sm:$0x1]  ;;  %s1147_s10 = scalar_lea.vmem [#allocation4], %s1143_s21  ;;  %s1161_s24 = sld [smem:[#allocation14 + %s2936_s12]] }
 0x415   : >> { %v1148_v47 = vld [vmem:[%s1147_s10] sm:$0x1]  ;;  %1146 = vst.msk [vmem:[#allocation8 + $0x4] sm:$0x1] %vm887_vm6, %v1145_v46  ;;  %s2949_s20 = sadd.s32 7, %s2903_s19  ;;  %s1273_s11 = sld [smem:[#allocation13 + %s2908_s14]] }
 0x416   : >> { %1149 = vst.msk [vmem:[#allocation9 + $0x4] sm:$0x1] %vm887_vm6, %v1148_v47  ;;  %s1169_s27 = sld [smem:[#allocation13 + %s2949_s20]] }
 0x417   : >> { %s1170_s13 = sld [smem:[#allocation14 + %s2949_s20]]  ;;  %s1153_s21 = scalar_lea.vmem [#allocation3], %s1151_s3 }
 0x418   : >> { %s1281_s9 = sld [smem:[#allocation13 + %s2911_s29]]  ;;  %v1154_v48 = vld [vmem:[%s1153_s21] sm:$0x1]  ;;  %s1156_s15 = scalar_lea.vmem [#allocation4], %s1152_s18 }
 0x419   : >> { %s1289_s6 = sld [smem:[#allocation13 + %s2919_s30]]  ;;  %v1157_v49 = vld [vmem:[%s1156_s15] sm:$0x1]  ;;  %1155 = vst.msk [vmem:[#allocation8 + $0x5] sm:$0x1] %vm887_vm6, %v1154_v48  ;;  %s1162_s4 = scalar_lea.vmem [#allocation3], %s1160_s17 }
 0x41a   : >> { %s1297_s10 = sld [smem:[#allocation13 + %s2922_s0]]  ;;  %1158 = vst.msk [vmem:[#allocation9 + $0x5] sm:$0x1] %vm887_vm6, %v1157_v49  ;;  %v1163_v50 = vld [vmem:[%s1162_s4] sm:$0x1]  ;;  %s1165_s2 = scalar_lea.vmem [#allocation4], %s1161_s24 }
 0x41b   : >> { %s2958_s28 = sld [smem:[#allocation13 + %s2933_s26]]  ;;  %v1166_v51 = vld [vmem:[%s1165_s2] sm:$0x1]  ;;  %1164 = vst.msk [vmem:[#allocation8 + $0x6] sm:$0x1] %vm887_vm6, %v1163_v50  ;;  %s1278_s3 = scalar_lea.vmem [#allocation6], %s1273_s11 }
 0x41c   : >> { %s1313_s5 = sld [smem:[#allocation13 + %s2936_s12]]  ;;  %1167 = vst.msk [vmem:[#allocation9 + $0x6] sm:$0x1] %vm887_vm6, %v1166_v51  ;;  %v1279_v52 = vld [vmem:[%s1278_s3] sm:$0x1]  ;;  %s1171_s18 = scalar_lea.vmem [#allocation3], %s1169_s27 }
 0x41d   : >> { %v1172_v53 = vld [vmem:[%s1171_s18] sm:$0x1]  ;;  %s1174_s21 = scalar_lea.vmem [#allocation4], %s1170_s13  ;;  %1280 = vst.msk [vmem:[#allocation11 + $0x1] sm:$0x1] %vm887_vm6, %v1279_v52  ;;  %s1321_s17 = sld [smem:[#allocation13 + %s2949_s20]] }
 0x41e   : >> { %v1175_v54 = vld [vmem:[%s1174_s21] sm:$0x1]  ;;  %1173 = vst.msk [vmem:[#allocation8 + $0x7] sm:$0x1] %vm887_vm6, %v1172_v53  ;;  %s1286_s2 = scalar_lea.vmem [#allocation6], %s1281_s9  ;;  %s1266_s9 = sld [smem:[#allocation14 + %s2903_s19]] }
 0x41f   : >> { %1176 = vst.msk [vmem:[#allocation9 + $0x7] sm:$0x1] %vm887_vm6, %v1175_v54  ;;  %v1287_v55 = vld [vmem:[%s1286_s2] sm:$0x1]  ;;  %s1294_s4 = scalar_lea.vmem [#allocation6], %s1289_s6  ;;  %s1274_s6 = sld [smem:[#allocation14 + %s2908_s14]] }
 0x420   : >> { %v1295_v56 = vld [vmem:[%s1294_s4] sm:$0x1]  ;;  %1288 = vst.msk [vmem:[#allocation11 + $0x2] sm:$0x1] %vm887_vm6, %v1287_v55  ;;  %s1302_s24 = scalar_lea.vmem [#allocation6], %s1297_s10  ;;  %s1282_s15 = sld [smem:[#allocation14 + %s2911_s29]] }
 0x421   : >> { %1296 = vst.msk [vmem:[#allocation11 + $0x3] sm:$0x1] %vm887_vm6, %v1295_v56  ;;  %v1303_v57 = vld [vmem:[%s1302_s24] sm:$0x1]  ;;  %s1310_s11 = scalar_lea.vmem [#allocation6], %s2958_s28  ;;  %s1265_s28 = sld [smem:[#allocation13 + %s2903_s19]] }
 0x422   : >> { %v1311_v58 = vld [vmem:[%s1310_s11] sm:$0x1]  ;;  %1304 = vst.msk [vmem:[#allocation11 + $0x4] sm:$0x1] %vm887_vm6, %v1303_v57  ;;  %s1318_s27 = scalar_lea.vmem [#allocation6], %s1313_s5  ;;  %s1290_s10 = sld [smem:[#allocation14 + %s2919_s30]] }
 0x423   : >> { %1312 = vst.msk [vmem:[#allocation11 + $0x5] sm:$0x1] %vm887_vm6, %v1311_v58  ;;  %v1319_v59 = vld [vmem:[%s1318_s27] sm:$0x1]  ;;  %s1326_s13 = scalar_lea.vmem [#allocation6], %s1321_s17  ;;  %s1298_s3 = sld [smem:[#allocation14 + %s2922_s0]] }
 0x424   : >> { %1320 = vst.msk [vmem:[#allocation11 + $0x6] sm:$0x1] %vm887_vm6, %v1319_v59  ;;  %v1327_v62 = vld [vmem:[%s1326_s13] sm:$0x1]  ;;  %s1306_s18 = sld [smem:[#allocation14 + %s2933_s26]]  ;;  %s1267_s4 = scalar_lea.vmem [#allocation5], %s1266_s9 }
 0x425   : >> { %v1177_v60 = vld [vmem:[#allocation8] sm:$0xff]  ;;  %1328 = vst.msk [vmem:[#allocation11 + $0x7] sm:$0x1] %vm887_vm6, %v1327_v62  ;;  %s1314_s21 = sld [smem:[#allocation14 + %s2936_s12]]  ;;  %s1275_s17 = scalar_lea.vmem [#allocation5], %s1274_s6 }
 0x426   : >> { %v1178_v61 = vld [vmem:[#allocation9] sm:$0xff]  ;;  %s1322_s2 = sld [smem:[#allocation14 + %s2949_s20]]  ;;  %v1268_v1 = vld [vmem:[%s1267_s4] sm:$0x1]  ;;  %s1283_s24 = scalar_lea.vmem [#allocation5], %s1282_s15 }
 0x427   : >> { %v1179_v63 = vmul.f32 %v1178_v61, %v1177_v60  ;;  %s1270_s5 = scalar_lea.vmem [#allocation6], %s1265_s28  ;;  %v1276_v2 = vld [vmem:[%s1275_s17] sm:$0x1]  ;;  %1269 = vst.msk [vmem:[#allocation10] sm:$0x1] %vm887_vm6, %v1268_v1  ;;  %s1335_s9 = sld [smem:[#allocation13 + %s2903_s19]] }
 0x428   : >> { %v1271_v0 = vld [vmem:[%s1270_s5] sm:$0x1]  ;;  %1277 = vst.msk [vmem:[#allocation10 + $0x1] sm:$0x1] %vm887_vm6, %v1276_v2  ;;  %s1291_s11 = scalar_lea.vmem [#allocation5], %s1290_s10  ;;  %s1340_s15 = sld [smem:[#allocation13 + %s2908_s14]] }
 0x429   : >> { %1874 = vmatmul.mubr.msk.f32.vlgmr.msra.gmra.mrb[0].mxu0 %vm645_vm3, %v1179_v63  ;;  %1272 = vst.msk [vmem:[#allocation11] sm:$0x1] %vm887_vm6, %v1271_v0  ;;  %v1284_v3 = vld [vmem:[%s1283_s24] sm:$0x1]  ;;  %s1299_s27 = scalar_lea.vmem [#allocation5], %s1298_s3  ;;  %s1348_s10 = sld [smem:[#allocation13 + %s2911_s29]] }
 0x42a   : >> { %v1292_v4 = vld [vmem:[%s1291_s11] sm:$0x1]  ;;  %1285 = vst.msk [vmem:[#allocation10 + $0x2] sm:$0x1] %vm887_vm6, %v1284_v3  ;;  %s1307_s13 = scalar_lea.vmem [#allocation5], %s1306_s18  ;;  %s1355_s3 = sld [smem:[#allocation13 + %s2919_s30]] }
 0x42b   : >> { %1293 = vst.msk [vmem:[#allocation10 + $0x3] sm:$0x1] %vm887_vm6, %v1292_v4  ;;  %v1300_v6 = vld [vmem:[%s1299_s27] sm:$0x1]  ;;  %s1315_s28 = scalar_lea.vmem [#allocation5], %s1314_s21  ;;  %s1362_s14 = sld [smem:[#allocation13 + %s2922_s0]] }
 0x42c   : >> { %v1308_v7 = vld [vmem:[%s1307_s13] sm:$0x1]  ;;  %1301 = vst.msk [vmem:[#allocation10 + $0x4] sm:$0x1] %vm887_vm6, %v1300_v6  ;;  %s1323_s5 = scalar_lea.vmem [#allocation5], %s1322_s2  ;;  %s1369_s29 = sld [smem:[#allocation13 + %s2933_s26]] }
 0x42d   : >> { %1309 = vst.msk [vmem:[#allocation10 + $0x5] sm:$0x1] %vm887_vm6, %v1308_v7  ;;  %v1316_v8 = vld [vmem:[%s1315_s28] sm:$0x1]  ;;  %s1336_s6 = scalar_lea.vmem [#allocation7], %s1335_s9  ;;  %s1376_s30 = sld [smem:[#allocation13 + %s2936_s12]] }
 0x42e   : >> { %v1324_v9 = vld [vmem:[%s1323_s5] sm:$0x1]  ;;  %1317 = vst.msk [vmem:[#allocation10 + $0x6] sm:$0x1] %vm887_vm6, %v1316_v8  ;;  %s1341_s19 = scalar_lea.vmem [#allocation7], %s1340_s15  ;;  %s1383_s0 = sld [smem:[#allocation13 + %s2949_s20]] }
 0x42f   : >> { %1325 = vst.msk [vmem:[#allocation10 + $0x7] sm:$0x1] %vm887_vm6, %v1324_v9  ;;  %v1337_v23 = vld [vmem:[%s1336_s6] sm:$0x1]  ;;  %s1349_s18 = scalar_lea.vmem [#allocation7], %s1348_s10  ;;  %s3160_s20 = sld [smem:[#allocation40_spill]] (%p1100_p0) }
 0x430   : >> { %v1329_v10 = vld [vmem:[#allocation11] sm:$0xff]  ;;  %s1356_s21 = scalar_lea.vmem [#allocation7], %s1355_s3  ;;  %s3162_s13 = sld [smem:[#allocation41_spill]] (%p1100_p0) }
 0x431   : >> { %v1330_v12 = vadd.f32 1e-08, %v1329_v10  ;;  %s1363_s2 = scalar_lea.vmem [#allocation7], %s1362_s14 }
 0x432   : >> { %s1370_s4 = scalar_lea.vmem [#allocation7], %s1369_s29 }
 0x433   : >> { %2050 = vrcp.f32 %v1330_v12  ;;  %s1377_s17 = scalar_lea.vmem [#allocation7], %s1376_s30 }
 0x434   : >> { %s1384_s26 = scalar_lea.vmem [#allocation7], %s1383_s0 }
 0x435   : > { %s3161_s24 = scalar_lea.vmem (%p1100_p0), %s3160_s20, %s2750_s16 }
 0x436   : >> { %v1333_v21 = vld [vmem:[#allocation10] sm:$0xff]  ;;  %s3163_s28 = scalar_lea.vmem (%p1100_p0), %s3162_s13, %s2750_s16 }
 0x437   : > { %v1770_v43 = vld [vmem:[%s3163_s28] ss:$0 sm:$0xff] (%p1100_p0) }
 0x43d   : >> { %v2051_v18 = vpop.eup %2050 }
 0x4fc   : >> { %v1249_v11 = vpop.f32.mrb[0].mxu0 }
 0x4fd   : >> { %v1768_v13 = vclamps-f32 %v1249_v11, 10.0  ;;  %v1875_v14 = vpop.f32.mrb[1].mxu0 }
 0x4ff   : >> { %v1255_v15 = vmul.f32 1.442695, %v1768_v13 }
 0x501   : >> { %2052 = vpow2.f32 %v1255_v15 }
 0x50b   : >> { %v2053_v19 = vpop.eup %2052 }
 0x50c   : >> { %v1264_v20 = vsel %vm1261_vm9, %v2053_v19, 0.0 }
 0x50d   : >> { %v1332_v22 = vmul.f32 %v2051_v18, %v1264_v20 }
 0x50f   : >> { %v1334_v24 = vmul.f32 %v1333_v21, %v1332_v22 }
 0x511   : >> { %v1338_v25 = vadd.f32 %v1337_v23, %v1334_v24  ;;  %v1344_v27 = vrot.slane %v1334_v24, 1  ;;  %v1351_v30 = vrot.slane %v1334_v24, 2  ;;  %v1358_v37 = vrot.slane %v1334_v24, 3 }
 0x512   : >> { %v1365_v31 = vrot.slane %v1334_v24, 4  ;;  %v1372_v34 = vrot.slane %v1334_v24, 5  ;;  %v1379_v44 = vrot.slane %v1334_v24, 6  ;;  %v1386_v47 = vrot.slane %v1334_v24, 7 }
 0x513   : >> { %1339 = vst.msk [vmem:[%s1336_s6] sm:$0x1] %vm887_vm6, %v1338_v25 }
 0x51a   : >> { %v1342_v28 = vld [vmem:[%s1341_s19] sm:$0x1] }
 0x51b   : >> { %v1346_v29 = vadd.f32 %v1344_v27, %v1342_v28 }
 0x51d   : >> { %1347 = vst.msk [vmem:[%s1341_s19] sm:$0x1] %vm887_vm6, %v1346_v29 }
 0x524   : >> { %v1350_v35 = vld [vmem:[%s1349_s18] sm:$0x1] }
 0x525   : >> { %v1353_v36 = vadd.f32 %v1351_v30, %v1350_v35 }
 0x527   : >> { %1354 = vst.msk [vmem:[%s1349_s18] sm:$0x1] %vm887_vm6, %v1353_v36 }
 0x52e   : >> { %v1357_v38 = vld [vmem:[%s1356_s21] sm:$0x1] }
 0x52f   : >> { %v1360_v39 = vadd.f32 %v1358_v37, %v1357_v38 }
 0x531   : >> { %1361 = vst.msk [vmem:[%s1356_s21] sm:$0x1] %vm887_vm6, %v1360_v39 }
 0x538   : >> { %v1364_v32 = vld [vmem:[%s1363_s2] sm:$0x1] }
 0x539   : >> { %v1367_v33 = vadd.f32 %v1365_v31, %v1364_v32 }
 0x53b   : >> { %1368 = vst.msk [vmem:[%s1363_s2] sm:$0x1] %vm887_vm6, %v1367_v33 }
 0x542   : >> { %v1371_v40 = vld [vmem:[%s1370_s4] sm:$0x1] }
 0x543   : >> { %v1374_v42 = vadd.f32 %v1372_v34, %v1371_v40 }
 0x545   : >> { %1375 = vst.msk [vmem:[%s1370_s4] sm:$0x1] %vm887_vm6, %v1374_v42 }
 0x54c   : >> { %v1378_v45 = vld [vmem:[%s1377_s17] sm:$0x1] }
 0x54d   : >> { %v1381_v46 = vadd.f32 %v1379_v44, %v1378_v45 }
 0x54f   : >> { %1382 = vst.msk [vmem:[%s1377_s17] sm:$0x1] %vm887_vm6, %v1381_v46 }
 0x553   : > { %1102 = sbr.rel (!%p1100_p0) target bundleno = 1028 (0x404), region = 241 }
 0x556   : >> { %v1385_v48 = vld [vmem:[%s1384_s26] sm:$0x1] }
 0x557   : >> { %v1388_v49 = vadd.f32 %v1386_v47, %v1385_v48 }
 0x559   : >> { %1389 = vst.msk [vmem:[%s1384_s26] sm:$0x1] %vm887_vm6, %v1388_v49 }
 0x55a   : > { %s3164_s6 = sld [smem:[#allocation42_spill]] (!%p1771_p1)  ;;  %v2370_v2 = vmov (!%p1771_p1), 0.0|0.0   ;;  %vm2371_vm10 = vmmov (!%p1771_p1), 0   ;;  %v2372_v6 = vmov (!%p1771_p1), 0.0   ;;  %s3165_s29 = sld [smem:[#allocation43_spill]] (!%p1771_p1) }
 0x55b   : > { %1920 = vmatprep.subr.bf16.mxu0 (!%p1771_p1), %v2370_v2  ;;  %1884 = vmatprep.mubr.msk.f32.mxu0 (!%p1771_p1), %vm2371_vm10, %v2372_v6 }
 0x560   : > { %v1390_v50 = vld [vmem:[#allocation7] sm:$0xff]  ;;  %v1427_v63 = vld [vmem:[%s3164_s6] sm:$0xff] (!%p1771_p1)  ;;  %v1428_v0 = vld [vmem:[%s3164_s6 + $0x8] sm:$0xff] (!%p1771_p1) }
 0x561   : > { %v1391_v51 = vadd.f32 %v1390_v50, %v2779_v26  ;;  %v1769_v26 = vld [vmem:[%s3161_s24] ss:$0 sm:$0xff]  ;;  %v1429_v1 = vld [vmem:[%s3164_s6 + $0x10] sm:$0xff] (!%p1771_p1)  ;;  %v1921_v3 = vpack.c.bf16 (!%p1771_p1), %v1428_v0, %v1427_v63  ;;  %v1430_v4 = vld [vmem:[%s3164_s6 + $0x18] sm:$0xff] (!%p1771_p1) }
 0x562   : > { %v1924_v7 = vpack.c.bf16 (!%p1771_p1), %v1430_v4, %v1429_v1  ;;  %v1772_v8 = vld [vmem:[%s3165_s29] ss:$0 sm:$0xff] (!%p1771_p1) }
 0x563   : > { %v1392_v52 = vsel %vm645_vm3, %v1391_v51, 0.0  ;;  %1922 = vmatpush3.bf16.msra.mxu0 (!%p1771_p1), %v1921_v3 }
 0x564   : > { %1393 = vadd.xlane.f32.xlu0 %v1392_v52  ;;  %1923 = vmatprep.subr.bf16.mxu0 (!%p1771_p1), %v2370_v2 }
 0x567   : > { %1925 = vmatpush3.bf16.msra.mxu0 (!%p1771_p1), %v1924_v7 }
 0x5f1   : > { %v1394_v53 = vpop.xlane.xlu0 %1393 }
 0x5f2   : > { %v1396_v54 = vmul.f32 0.03125, %v1394_v53 }
 0x5f4   : > { %v1397_v55 = vsub.f32 %v1391_v51, %v1396_v54 }
 0x5f6   : > { %v1398_v56 = vmul.f32 %v1397_v55, %v1397_v55 }
 0x5f8   : > { %v1399_v57 = vsel %vm645_vm3, %v1398_v56, 0.0 }
 0x5f9   : > { %1400 = vadd.xlane.f32.xlu0 %v1399_v57 }
 0x686   : > { %v1401_v58 = vpop.xlane.xlu0 %1400 }
 0x687   : > { %v1402_v59 = vmul.f32 0.03125, %v1401_v58 }
 0x689   : > { %v1403_v60 = vadd.f32 1e-06, %v1402_v59 }
 0x68b   : > { %2054 = vrsqrt.f32 %v1403_v60 }
 0x695   : > { %v2055_v61 = vpop.eup %2054 }
 0x696   : > { %v1405_v41 = vmul.f32 %v2055_v61, %v1397_v55  ;;  %1426 = sbr.rel (%p1771_p1) target bundleno = 1907 (0x773), region = 110 }
 0x698   : > { %v1413_v5 = vmul.f32 %v1769_v26, %v1405_v41 }
 0x69a   : > { %v1421_v62 = vadd.f32 %v1770_v43, %v1413_v5 }
 0x69c   : > { %1422 = vst.msk [vmem:[#allocation2] sm:$0xff] %vm645_vm3, %v1421_v62  ;;  %1885 = vmatmul.mubr.msk.f32.vlgmr.msra.gmra.mrb[0].mxu0 (!%p1771_p1), %vm645_vm3, %v1421_v62 }
 0x76f   : > { %v1507_v9 = vpop.f32.mrb[0].mxu0 }
 0x770   : > { %v1508_v10 = vadd.f32 %v1772_v8, %v1507_v9  ;;  %v1886_v11 = vpop.f32.mrb[1].mxu0 }
 0x772   : > { %1511 = vst [vmem:[#allocation26] sm:$0xff] %v1508_v10 }
 0x773 PF: > { %p1975_p5 = scmp.eq.s32.totalorder %s2478_s25, 1  ;;  %s2373_s2 = smov [#allocation26]  }
 0x774   : > { %s1519_s30 = sshll.u32 %s2373_s2, 4  ;;  %s1520_s30 = int_to_ptr.vmem [resolvable:$true] %s1519_s30 }
 0x775   : > { %s2252_s4 = scalar_lea.vmem %s1520_s30, 128  ;;  %p2259_p6 = scmp.lt.s32.totalorder %s1520_s30, %s1520_s30 }
 0x776   : > { %p2253_p12 = scmp.ne.s32.totalorder %s1520_s30, %s2252_s4  ;;  %p2260_p3 = scmp.lt.s32.totalorder %s2252_s4, %s2252_s4 }
 0x778   : > { %p2254_p13 = pnand %p2253_p12, %p1975_p5  ;;  %p2261_p7 = por %p2260_p3, %p2259_p6 }
 0x77a   : > { %p2255_p9 = pneg %p2254_p13 }
 0x77c   : > { %p2262_p10 = pnand %p2261_p7, %p2255_p9 }
 0x77e   : > { %2265 = shalt.err (!%p2262_p10)
}
 0x77f   : > { %s3166_s26 = sld [smem:[#allocation44_spill]] }
 0x785   : > { %s2266_s22 = scalar_lea.hbm %s3166_s26, 128 }
 0x786   : > { %p2267_p8 = scmp.ne.s32.totalorder %s3166_s26, %s2266_s22  ;;  %p2272_p2 = scmp.lt.u32.totalorder %s2266_s22, %s3166_s26 }
 0x788   : > { %p2268_p11 = pnand %p2267_p8, %p1975_p5 }
 0x78a   : > { %p2269_p4 = pneg %p2268_p11 }
 0x78c   : > { %p2274_p0 = pnand %p2272_p2, %p2269_p4 }
 0x78e   : > { %2277 = shalt.err (!%p2274_p0)
}
 0x78f   : > { %1945 = dma.vmem_to_hbm [thread:$0]  (%p1975_p5), %s1520_s30, 128, %s3166_s26, [#allocation17]  }
 0x790   : > { %2321 = dma.done.wait (%p1975_p5), [#allocation17], 128  }
 0x791   : > { %2323 = vsyncadd (%p1975_p5), [#allocation17], 4294967168 }
 0x792 PF: > { %s3167_s24 = sld [smem:[#allocation33_spill]]  ;;  %s3168_s28 = sld [smem:[#allocation34_spill]] }
 0x793   : > { %s3169_s0 = smov %s2330_s1  ;;  %s3170_s1 = smov %s2334_s23 }
 0x798   : > { %p37_p1 = scmp.ge.s32.totalorder %s3167_s24, 4   ;;  %s3171_s23 = smov %s3168_s28 }
 0x79a   :  { %39 = sbr.rel (!%p37_p1) target bundleno = 35 (0x23), region = 252 }
 0x7a1   :  { %1532 = vsyncpa [#allocation16], 1 }
 0x7a2   :  { %1534 = vsyncpa [#allocation16 + $0x1], 1 }
 0x7a3   :  { %1535 = vsyncpa [#allocation19], 1 }
 0x7a4   :  { %1536 = vsyncpa [#allocation22], 1 }
 0x7a5   :  { %1538 = vsyncpa [#allocation22 + $0x1], 1 }
 0x7a6   :  { %1539 = vsyncpa [#allocation25], 1 }
 0x7a7   :  { %1541 = vsyncpa [#allocation25 + $0x1], 1 }
 0x7a8   :  { %1542 = vsyncpa [#allocation17], 1 }
 0x7a9   :  { %1544 = vsyncpa [#allocation17 + $0x1], 1 }

</bundles_post_ra>
